<compile_context>
chip_gen: v6e
topology: v6e:2x2x1
jax: 0.10.0
libtpu: 0.0.40
codegen_flags: <defaults>
</compile_context>

<pallas_src>
import math
import functools

import jax
import jax.numpy as jnp
from jax.experimental import pallas as pl


# ---------------------------------------------------------------------------
# Fused kernel: nlayers x (MHA + FFN + 2x LayerNorm) + decoder Linear.
# Single invocation (no grid); every array is whole-block resident in VMEM.
# Activation rows are ordered (s, b):  row = s*B + b,  with N = S*B rows.
# ---------------------------------------------------------------------------
def fused_forward_kernel(x_ref, mask_ref,
                         wqkvT_ref, bqkv_ref, woT_ref, bo_ref,
                         g1_ref, be1_ref, w1T_ref, b1_ref, w2T_ref, b2_ref,
                         g2_ref, be2_ref, wdT_ref, bd_ref, o_ref,
                         *, nlayers, nhead, hd, n_rows, eps):
    E = nhead * hd
    N = n_rows
    scale = 1.0 / math.sqrt(hd)

    x = x_ref[...]                    # (N, E) f32
    mask = mask_ref[...]              # (nhead*N, nhead*N) f32 additive mask

    def layernorm(y, g, beta):
        mu = jnp.mean(y, axis=-1, keepdims=True)
        var = jnp.mean(jnp.square(y - mu), axis=-1, keepdims=True)
        return (y - mu) * jax.lax.rsqrt(var + eps) * g + beta

    for l in range(nlayers):          # nlayers is tiny & static
        xb = x.astype(jnp.bfloat16)

        # Fused QKV projection: one (N, E) @ (E, 3E) MXU push.
        qkv = jnp.dot(xb, wqkvT_ref[l],
                      preferred_element_type=jnp.float32) + bqkv_ref[l]
        qkvb = qkv.astype(jnp.bfloat16)                 # (N, 3E)

        # Repack heads along rows: (nhead*N, hd), rows ordered (h, s, b).
        q_p = jnp.concatenate(
            [qkvb[:, h * hd:(h + 1) * hd] for h in range(nhead)], axis=0)
        k_p = jnp.concatenate(
            [qkvb[:, E + h * hd:E + (h + 1) * hd] for h in range(nhead)], axis=0)
        v_p = jnp.concatenate(
            [qkvb[:, 2 * E + h * hd:2 * E + (h + 1) * hd] for h in range(nhead)],
            axis=0)

        # One scores matmul + one p@v matmul cover all batches & heads; the
        # precomputed mask kills cross-(head, batch) attention.
        scores = jax.lax.dot_general(                   # (nhead*N, nhead*N)
            q_p, k_p, (((1,), (1,)), ((), ())),
            preferred_element_type=jnp.float32) * scale + mask
        m = jnp.max(scores, axis=-1, keepdims=True)
        e = jnp.exp(scores - m)
        denom = jnp.sum(e, axis=-1, keepdims=True)
        p = e * pl.reciprocal(denom, approx=True)       # EUP reciprocal
        ctx = jnp.dot(p.astype(jnp.bfloat16), v_p,      # (nhead*N, hd) f32
                      preferred_element_type=jnp.float32)

        # Fold each head's context straight into the E-wide (lane-dense)
        # output projection:  ctx @ Wo == sum_h ctx_h @ Wo[h*hd:(h+1)*hd, :].
        woTl = woT_ref[l]                               # (E, E) bf16
        attn = jnp.zeros_like(x)                        # (N, E) f32
        for h in range(nhead):                          # nhead is tiny & static
            ctx_h = ctx[h * N:(h + 1) * N, :].astype(jnp.bfloat16)
            attn = attn + jnp.dot(ctx_h, woTl[h * hd:(h + 1) * hd, :],
                                  preferred_element_type=jnp.float32)
        attn = attn + bo_ref[l]

        # Post-norm encoder layer (PyTorch default norm_first=False), relu FFN.
        y1 = layernorm(x + attn, g1_ref[l], be1_ref[l])
        h1 = jnp.maximum(
            jnp.dot(y1.astype(jnp.bfloat16), w1T_ref[l],
                    preferred_element_type=jnp.float32) + b1_ref[l], 0.0)
        ff = jnp.dot(h1.astype(jnp.bfloat16), w2T_ref[l],
                     preferred_element_type=jnp.float32) + b2_ref[l]
        x = layernorm(y1 + ff, g2_ref[l], be2_ref[l])

    # Decoder: Linear(E -> ntoken_padded), lane-dense output store.
    logits = jnp.dot(x.astype(jnp.bfloat16), wdT_ref[...],
                     preferred_element_type=jnp.float32) + bd_ref[...]
    o_ref[...] = logits


# ---------------------------------------------------------------------------
# Parameter init (deterministic, shapes match the PyTorch module)
# ---------------------------------------------------------------------------
def _round_up(x, m):
    return ((x + m - 1) // m) * m


def make_positional_encoding(max_len, d_model):
    position = jnp.arange(max_len, dtype=jnp.float32)[:, None]
    div_term = jnp.exp(jnp.arange(0, d_model, 2, dtype=jnp.float32)
                       * (-math.log(10000.0) / d_model))
    pe = jnp.zeros((max_len, d_model), jnp.float32)
    pe = pe.at[:, 0::2].set(jnp.sin(position * div_term))
    pe = pe.at[:, 1::2].set(jnp.cos(position * div_term))
    return pe  # (max_len, d_model)


_LAYER_NAMES = ["wqkvT", "bqkv", "woT", "bo", "g1", "be1",
                "w1T", "b1", "w2T", "b2", "g2", "be2"]
_MATMUL_WEIGHTS = {"wqkvT", "woT", "w1T", "w2T"}   # stored bf16


def init_params(key, *, ntoken, ninp, nhead, nhid, nlayers, max_len=5000):
    initrange = 0.1
    E = ninp
    ntoken_p = _round_up(ntoken, 128)           # lane-dense decoder output
    keys = jax.random.split(key, 2 + nlayers)

    emb = jax.random.uniform(keys[0], (ntoken, E), jnp.float32,
                             -initrange, initrange)
    dec_w = jax.random.uniform(keys[1], (ntoken, E), jnp.float32,
                               -initrange, initrange)
    wdT = jnp.zeros((E, ntoken_p), jnp.float32).at[:, :ntoken].set(dec_w.T)

    params = {
        # sqrt(E) scale of the forward pass is pre-folded into the table.
        "embedding": emb * math.sqrt(E),
        "wdT": wdT.astype(jnp.bfloat16),        # (E, ntoken_padded)
        "bd": jnp.zeros((1, ntoken_p), jnp.float32),
        "pe": make_positional_encoding(max_len, E),
    }

    stacks = {name: [] for name in _LAYER_NAMES}
    for l in range(nlayers):
        lk = jax.random.split(keys[2 + l], 6)
        in_proj_w = jax.random.normal(lk[0], (3 * E, E), jnp.float32) / math.sqrt(E)
        out_w = jax.random.normal(lk[1], (E, E), jnp.float32) / math.sqrt(E)
        w1 = jax.random.normal(lk[2], (nhid, E), jnp.float32) / math.sqrt(E)
        w2 = jax.random.normal(lk[3], (E, nhid), jnp.float32) / math.sqrt(nhid)
        b1 = 0.01 * jax.random.normal(lk[4], (1, nhid), jnp.float32)
        b2 = 0.01 * jax.random.normal(lk[5], (1, E), jnp.float32)

        # in_proj_w.T columns are ordered [Wq.T | Wk.T | Wv.T]  -> x @ it = [q|k|v]
        stacks["wqkvT"].append(in_proj_w.T)
        stacks["bqkv"].append(jnp.zeros((1, 3 * E)))
        stacks["woT"].append(out_w.T)
        stacks["bo"].append(jnp.zeros((1, E)))
        stacks["g1"].append(jnp.ones((1, E)))
        stacks["be1"].append(jnp.zeros((1, E)))
        stacks["w1T"].append(w1.T)
        stacks["b1"].append(b1)
        stacks["w2T"].append(w2.T)
        stacks["b2"].append(b2)
        stacks["g2"].append(jnp.ones((1, E)))
        stacks["be2"].append(jnp.zeros((1, E)))

    params["layers"] = {
        name: jnp.stack(vals).astype(
            jnp.bfloat16 if name in _MATMUL_WEIGHTS else jnp.float32)
        for name, vals in stacks.items()
    }
    return params


# ---------------------------------------------------------------------------
# Mask packing: (S, S) additive mask -> (H*S*B, H*S*B) mask for the packed
# (head, seq, batch) attention layout (row = h*(S*B) + s*B + b).  Entries that
# cross a (head, batch) group are -inf so one matmul covers everything.
# ---------------------------------------------------------------------------
def pack_attention_mask(src_mask, S, B, nhead):
    n = nhead * S * B
    idx = jnp.arange(n)
    h = idx // (S * B)
    sb = idx % (S * B)
    s = sb // B
    b = sb % B
    same = (h[:, None] == h[None, :]) & (b[:, None] == b[None, :])
    base = src_mask[s[:, None], s[None, :]]
    # TODO(synk): a user mask with a fully-masked row would make the softmax
    #             denominator 0 (NaN with approx reciprocal); causal masks are safe.
    return jnp.where(same, base, -jnp.inf).astype(jnp.float32)


# ---------------------------------------------------------------------------
# Forward wrapper
# ---------------------------------------------------------------------------
def transformer_forward(src_tokens, src_mask, params, *, nhead):
    S, B = src_tokens.shape
    ntoken, E = params["embedding"].shape
    ntoken_p = params["wdT"].shape[1]
    nlayers = params["layers"]["wqkvT"].shape[0]
    hd = E // nhead
    N = S * B

    # Embedding gather (table pre-scaled by sqrt(E)) + positional encoding:
    # cheap XLA glue fused with the gather.  Kept in PyTorch (S, B, E) order
    # and flattened row-major => NO transposes anywhere around the kernel.
    x = params["embedding"][src_tokens] + params["pe"][:S][:, None, :]  # (S,B,E)
    x = x.reshape(N, E)

    packed_mask = pack_attention_mask(src_mask, S, B, nhead)            # (H*N, H*N)

    layer_args = [params["layers"][name] for name in _LAYER_NAMES]

    kernel = functools.partial(fused_forward_kernel, nlayers=nlayers,
                               nhead=nhead, hd=hd, n_rows=N, eps=1e-5)

    # Single grid-less call: whole model resident in VMEM, weights DMA'd once,
    # no per-step pipeline overhead, no double-buffering of constants.
    logits = pl.pallas_call(
        kernel,
        out_shape=jax.ShapeDtypeStruct((N, ntoken_p), jnp.float32),
    )(x, packed_mask, *layer_args, params["wdT"], params["bd"])

    logits = logits.reshape(S, B, ntoken_p)       # free row-major reshape
    if ntoken_p != ntoken:
        logits = logits[..., :ntoken]             # drop lane padding
    return logits                                  # (S, B, ntoken), PyTorch layout


def generate_square_subsequent_mask(sz):
    idx = jnp.arange(sz)
    return jnp.where(idx[None, :] <= idx[:, None], 0.0,
                     -jnp.inf).astype(jnp.float32)


# ---------------------------------------------------------------------------
if __name__ == "__main__":
    # Small shapes consistent with the module: seq=8, batch=2, ninp=32,
    # nhead=2, nhid=64, nlayers=2, ntoken=64.
    S, B = 8, 2
    NTOKEN, NINP, NHEAD, NHID, NLAYERS = 64, 32, 2, 64, 2

    key = jax.random.PRNGKey(0)
    k_param, k_tok = jax.random.split(key)

    params = init_params(k_param, ntoken=NTOKEN, ninp=NINP, nhead=NHEAD,
                         nhid=NHID, nlayers=NLAYERS)
    src = jax.random.randint(k_tok, (S, B), 0, NTOKEN, dtype=jnp.int32)
    src_mask = generate_square_subsequent_mask(S)

    fwd = jax.jit(functools.partial(transformer_forward, nhead=NHEAD))
    out = jax.block_until_ready(fwd(src, src_mask, params))

    assert out.shape == (S, B, NTOKEN), out.shape
    assert bool(jnp.all(jnp.isfinite(out)))
    print("KERNEL_OK")
</pallas_src>

<mosaic_0001>
module attributes {stable_mosaic.version = 11 : i64} {
  func.func @fused_forward_kernel(%arg0: memref<16x32xf32, #tpu.memory_space<vmem>>, %arg1: memref<32x32xf32, #tpu.memory_space<vmem>>, %arg2: memref<2x32x96xbf16, #tpu.memory_space<vmem>>, %arg3: memref<2x1x96xf32, #tpu.memory_space<vmem>>, %arg4: memref<2x32x32xbf16, #tpu.memory_space<vmem>>, %arg5: memref<2x1x32xf32, #tpu.memory_space<vmem>>, %arg6: memref<2x1x32xf32, #tpu.memory_space<vmem>>, %arg7: memref<2x1x32xf32, #tpu.memory_space<vmem>>, %arg8: memref<2x32x64xbf16, #tpu.memory_space<vmem>>, %arg9: memref<2x1x64xf32, #tpu.memory_space<vmem>>, %arg10: memref<2x64x32xbf16, #tpu.memory_space<vmem>>, %arg11: memref<2x1x32xf32, #tpu.memory_space<vmem>>, %arg12: memref<2x1x32xf32, #tpu.memory_space<vmem>>, %arg13: memref<2x1x32xf32, #tpu.memory_space<vmem>>, %arg14: memref<32x128xbf16, #tpu.memory_space<vmem>>, %arg15: memref<1x128xf32, #tpu.memory_space<vmem>>, %arg16: memref<16x128xf32, #tpu.memory_space<vmem>>) attributes {dimension_semantics = [], scalar_prefetch = 0 : i64, scratch_operands = 0 : i64, tpu.core_type = #tpu.core_type<tc>} {
    %c0 = arith.constant 0 : index
    %c0_0 = arith.constant 0 : index
    %0 = vector.load %arg0[%c0, %c0_0] : memref<16x32xf32, #tpu.memory_space<vmem>>, vector<16x32xf32>
    %c0_1 = arith.constant 0 : index
    %c0_2 = arith.constant 0 : index
    %1 = vector.load %arg1[%c0_1, %c0_2] : memref<32x32xf32, #tpu.memory_space<vmem>>, vector<32x32xf32>
    %2 = arith.truncf %0 : vector<16x32xf32> to vector<16x32xbf16>
    %c0_3 = arith.constant 0 : index
    %c0_4 = arith.constant 0 : index
    %c0_5 = arith.constant 0 : index
    %3 = vector.load %arg2[%c0_3, %c0_4, %c0_5] : memref<2x32x96xbf16, #tpu.memory_space<vmem>>, vector<1x32x96xbf16>
    %4 = vector.shape_cast %3 : vector<1x32x96xbf16> to vector<32x96xbf16>
    %cst = arith.constant dense<0.000000e+00> : vector<16x96xf32>
    %5 = tpu.matmul %2, %4, %cst {dimension_numbers = #tpu.dot_dimension_numbers<[1], [0], [0], [1], [0, 0, 1, 1], [], []>} : vector<16x32xbf16>, vector<32x96xbf16>, vector<16x96xf32> -> vector<16x96xf32>
    %c0_6 = arith.constant 0 : index
    %c0_7 = arith.constant 0 : index
    %c0_8 = arith.constant 0 : index
    %6 = vector.load %arg3[%c0_6, %c0_7, %c0_8] : memref<2x1x96xf32, #tpu.memory_space<vmem>>, vector<1x1x96xf32>
    %7 = vector.shape_cast %6 : vector<1x1x96xf32> to vector<1x96xf32>
    %8 = vector.broadcast %7 : vector<1x96xf32> to vector<16x96xf32>
    %9 = arith.addf %5, %8 : vector<16x96xf32>
    %10 = arith.truncf %9 : vector<16x96xf32> to vector<16x96xbf16>
    %11 = vector.extract_strided_slice %10 {offsets = [0, 0], sizes = [16, 16], strides = [1, 1]} : vector<16x96xbf16> to vector<16x16xbf16>
    %12 = vector.extract_strided_slice %10 {offsets = [0, 16], sizes = [16, 16], strides = [1, 1]} : vector<16x96xbf16> to vector<16x16xbf16>
    %13 = tpu.concatenate %11, %12 in 0 : vector<16x16xbf16>, vector<16x16xbf16> -> vector<32x16xbf16>
    %14 = vector.extract_strided_slice %10 {offsets = [0, 32], sizes = [16, 16], strides = [1, 1]} : vector<16x96xbf16> to vector<16x16xbf16>
    %15 = vector.extract_strided_slice %10 {offsets = [0, 48], sizes = [16, 16], strides = [1, 1]} : vector<16x96xbf16> to vector<16x16xbf16>
    %16 = tpu.concatenate %14, %15 in 0 : vector<16x16xbf16>, vector<16x16xbf16> -> vector<32x16xbf16>
    %17 = vector.extract_strided_slice %10 {offsets = [0, 64], sizes = [16, 16], strides = [1, 1]} : vector<16x96xbf16> to vector<16x16xbf16>
    %18 = vector.extract_strided_slice %10 {offsets = [0, 80], sizes = [16, 16], strides = [1, 1]} : vector<16x96xbf16> to vector<16x16xbf16>
    %19 = tpu.concatenate %17, %18 in 0 : vector<16x16xbf16>, vector<16x16xbf16> -> vector<32x16xbf16>
    %cst_9 = arith.constant dense<0.000000e+00> : vector<32x32xf32>
    %20 = tpu.matmul %13, %16, %cst_9 {dimension_numbers = #tpu.dot_dimension_numbers<[1], [1], [0], [0], [0, 0, 1, 0], [], []>} : vector<32x16xbf16>, vector<32x16xbf16>, vector<32x32xf32> -> vector<32x32xf32>
    %cst_10 = arith.constant 2.500000e-01 : f32
    %21 = vector.broadcast %cst_10 : f32 to vector<32x32xf32>
    %22 = arith.mulf %20, %21 : vector<32x32xf32>
    %23 = arith.addf %22, %1 : vector<32x32xf32>
    %cst_11 = arith.constant dense<0xFF800000> : vector<32xf32>
    %24 = vector.multi_reduction <maximumf>, %23, %cst_11 [1] : vector<32x32xf32> to vector<32xf32>
    %25 = vector.shape_cast %24 : vector<32xf32> to vector<32x1xf32>
    %26 = vector.broadcast %25 : vector<32x1xf32> to vector<32x32xf32>
    %27 = arith.subf %23, %26 : vector<32x32xf32>
    %28 = math.exp %27 : vector<32x32xf32>
    %cst_12 = arith.constant dense<0.000000e+00> : vector<32xf32>
    %29 = vector.multi_reduction <add>, %28, %cst_12 [1] : vector<32x32xf32> to vector<32xf32>
    %30 = vector.shape_cast %29 : vector<32xf32> to vector<32x1xf32>
    %31 = tpu.reciprocal %30 {approx = true} : vector<32x1xf32> -> vector<32x1xf32>
    %32 = vector.broadcast %31 : vector<32x1xf32> to vector<32x32xf32>
    %33 = arith.mulf %28, %32 : vector<32x32xf32>
    %34 = arith.truncf %33 : vector<32x32xf32> to vector<32x32xbf16>
    %cst_13 = arith.constant dense<0.000000e+00> : vector<32x16xf32>
    %35 = tpu.matmul %34, %19, %cst_13 {dimension_numbers = #tpu.dot_dimension_numbers<[1], [0], [0], [1], [0, 0, 1, 1], [], []>} : vector<32x32xbf16>, vector<32x16xbf16>, vector<32x16xf32> -> vector<32x16xf32>
    %c0_14 = arith.constant 0 : index
    %c0_15 = arith.constant 0 : index
    %c0_16 = arith.constant 0 : index
    %36 = vector.load %arg4[%c0_14, %c0_15, %c0_16] : memref<2x32x32xbf16, #tpu.memory_space<vmem>>, vector<1x32x32xbf16>
    %37 = vector.shape_cast %36 : vector<1x32x32xbf16> to vector<32x32xbf16>
    %cst_17 = arith.constant 0.000000e+00 : f32
    %38 = vector.broadcast %cst_17 : f32 to vector<16x32xf32>
    %39 = vector.extract_strided_slice %35 {offsets = [0, 0], sizes = [16, 16], strides = [1, 1]} : vector<32x16xf32> to vector<16x16xf32>
    %40 = arith.truncf %39 : vector<16x16xf32> to vector<16x16xbf16>
    %41 = vector.extract_strided_slice %37 {offsets = [0, 0], sizes = [16, 32], strides = [1, 1]} : vector<32x32xbf16> to vector<16x32xbf16>
    %cst_18 = arith.constant dense<0.000000e+00> : vector<16x32xf32>
    %42 = tpu.matmul %40, %41, %cst_18 {dimension_numbers = #tpu.dot_dimension_numbers<[1], [0], [0], [1], [0, 0, 1, 1], [], []>} : vector<16x16xbf16>, vector<16x32xbf16>, vector<16x32xf32> -> vector<16x32xf32>
    %43 = arith.addf %38, %42 : vector<16x32xf32>
    %44 = vector.extract_strided_slice %35 {offsets = [16, 0], sizes = [16, 16], strides = [1, 1]} : vector<32x16xf32> to vector<16x16xf32>
    %45 = arith.truncf %44 : vector<16x16xf32> to vector<16x16xbf16>
    %46 = vector.extract_strided_slice %37 {offsets = [16, 0], sizes = [16, 32], strides = [1, 1]} : vector<32x32xbf16> to vector<16x32xbf16>
    %cst_19 = arith.constant dense<0.000000e+00> : vector<16x32xf32>
    %47 = tpu.matmul %45, %46, %cst_19 {dimension_numbers = #tpu.dot_dimension_numbers<[1], [0], [0], [1], [0, 0, 1, 1], [], []>} : vector<16x16xbf16>, vector<16x32xbf16>, vector<16x32xf32> -> vector<16x32xf32>
    %48 = arith.addf %43, %47 : vector<16x32xf32>
    %c0_20 = arith.constant 0 : index
    %c0_21 = arith.constant 0 : index
    %c0_22 = arith.constant 0 : index
    %49 = vector.load %arg5[%c0_20, %c0_21, %c0_22] : memref<2x1x32xf32, #tpu.memory_space<vmem>>, vector<1x1x32xf32>
    %50 = vector.shape_cast %49 : vector<1x1x32xf32> to vector<1x32xf32>
    %51 = vector.broadcast %50 : vector<1x32xf32> to vector<16x32xf32>
    %52 = arith.addf %48, %51 : vector<16x32xf32>
    %53 = arith.addf %0, %52 : vector<16x32xf32>
    %c0_23 = arith.constant 0 : index
    %c0_24 = arith.constant 0 : index
    %c0_25 = arith.constant 0 : index
    %54 = vector.load %arg6[%c0_23, %c0_24, %c0_25] : memref<2x1x32xf32, #tpu.memory_space<vmem>>, vector<1x1x32xf32>
    %55 = vector.shape_cast %54 : vector<1x1x32xf32> to vector<1x32xf32>
    %c0_26 = arith.constant 0 : index
    %c0_27 = arith.constant 0 : index
    %c0_28 = arith.constant 0 : index
    %56 = vector.load %arg7[%c0_26, %c0_27, %c0_28] : memref<2x1x32xf32, #tpu.memory_space<vmem>>, vector<1x1x32xf32>
    %57 = vector.shape_cast %56 : vector<1x1x32xf32> to vector<1x32xf32>
    %cst_29 = arith.constant dense<0.000000e+00> : vector<16xf32>
    %58 = vector.multi_reduction <add>, %53, %cst_29 [1] : vector<16x32xf32> to vector<16xf32>
    %59 = vector.shape_cast %58 : vector<16xf32> to vector<16x1xf32>
    %cst_30 = arith.constant 3.200000e+01 : f32
    %60 = vector.broadcast %cst_30 : f32 to vector<16x1xf32>
    %61 = arith.divf %59, %60 : vector<16x1xf32>
    %62 = vector.broadcast %61 : vector<16x1xf32> to vector<16x32xf32>
    %63 = arith.subf %53, %62 : vector<16x32xf32>
    %64 = arith.mulf %63, %63 : vector<16x32xf32>
    %cst_31 = arith.constant dense<0.000000e+00> : vector<16xf32>
    %65 = vector.multi_reduction <add>, %64, %cst_31 [1] : vector<16x32xf32> to vector<16xf32>
    %66 = vector.shape_cast %65 : vector<16xf32> to vector<16x1xf32>
    %cst_32 = arith.constant 3.200000e+01 : f32
    %67 = vector.broadcast %cst_32 : f32 to vector<16x1xf32>
    %68 = arith.divf %66, %67 : vector<16x1xf32>
    %69 = vector.broadcast %61 : vector<16x1xf32> to vector<16x32xf32>
    %70 = arith.subf %53, %69 : vector<16x32xf32>
    %cst_33 = arith.constant 9.99999974E-6 : f32
    %71 = vector.broadcast %cst_33 : f32 to vector<16x1xf32>
    %72 = arith.addf %68, %71 : vector<16x1xf32>
    %73 = math.rsqrt %72 : vector<16x1xf32>
    %74 = vector.broadcast %73 : vector<16x1xf32> to vector<16x32xf32>
    %75 = arith.mulf %70, %74 : vector<16x32xf32>
    %76 = vector.broadcast %55 : vector<1x32xf32> to vector<16x32xf32>
    %77 = arith.mulf %75, %76 : vector<16x32xf32>
    %78 = vector.broadcast %57 : vector<1x32xf32> to vector<16x32xf32>
    %79 = arith.addf %77, %78 : vector<16x32xf32>
    %80 = arith.truncf %79 : vector<16x32xf32> to vector<16x32xbf16>
    %c0_34 = arith.constant 0 : index
    %c0_35 = arith.constant 0 : index
    %c0_36 = arith.constant 0 : index
    %81 = vector.load %arg8[%c0_34, %c0_35, %c0_36] : memref<2x32x64xbf16, #tpu.memory_space<vmem>>, vector<1x32x64xbf16>
    %82 = vector.shape_cast %81 : vector<1x32x64xbf16> to vector<32x64xbf16>
    %cst_37 = arith.constant dense<0.000000e+00> : vector<16x64xf32>
    %83 = tpu.matmul %80, %82, %cst_37 {dimension_numbers = #tpu.dot_dimension_numbers<[1], [0], [0], [1], [0, 0, 1, 1], [], []>} : vector<16x32xbf16>, vector<32x64xbf16>, vector<16x64xf32> -> vector<16x64xf32>
    %c0_38 = arith.constant 0 : index
    %c0_39 = arith.constant 0 : index
    %c0_40 = arith.constant 0 : index
    %84 = vector.load %arg9[%c0_38, %c0_39, %c0_40] : memref<2x1x64xf32, #tpu.memory_space<vmem>>, vector<1x1x64xf32>
    %85 = vector.shape_cast %84 : vector<1x1x64xf32> to vector<1x64xf32>
    %86 = vector.broadcast %85 : vector<1x64xf32> to vector<16x64xf32>
    %87 = arith.addf %83, %86 : vector<16x64xf32>
    %cst_41 = arith.constant 0.000000e+00 : f32
    %88 = vector.broadcast %cst_41 : f32 to vector<16x64xf32>
    %89 = arith.maximumf %87, %88 : vector<16x64xf32>
    %90 = arith.truncf %89 : vector<16x64xf32> to vector<16x64xbf16>
    %c0_42 = arith.constant 0 : index
    %c0_43 = arith.constant 0 : index
    %c0_44 = arith.constant 0 : index
    %91 = vector.load %arg10[%c0_42, %c0_43, %c0_44] : memref<2x64x32xbf16, #tpu.memory_space<vmem>>, vector<1x64x32xbf16>
    %92 = vector.shape_cast %91 : vector<1x64x32xbf16> to vector<64x32xbf16>
    %cst_45 = arith.constant dense<0.000000e+00> : vector<16x32xf32>
    %93 = tpu.matmul %90, %92, %cst_45 {dimension_numbers = #tpu.dot_dimension_numbers<[1], [0], [0], [1], [0, 0, 1, 1], [], []>} : vector<16x64xbf16>, vector<64x32xbf16>, vector<16x32xf32> -> vector<16x32xf32>
    %c0_46 = arith.constant 0 : index
    %c0_47 = arith.constant 0 : index
    %c0_48 = arith.constant 0 : index
    %94 = vector.load %arg11[%c0_46, %c0_47, %c0_48] : memref<2x1x32xf32, #tpu.memory_space<vmem>>, vector<1x1x32xf32>
    %95 = vector.shape_cast %94 : vector<1x1x32xf32> to vector<1x32xf32>
    %96 = vector.broadcast %95 : vector<1x32xf32> to vector<16x32xf32>
    %97 = arith.addf %93, %96 : vector<16x32xf32>
    %98 = arith.addf %79, %97 : vector<16x32xf32>
    %c0_49 = arith.constant 0 : index
    %c0_50 = arith.constant 0 : index
    %c0_51 = arith.constant 0 : index
    %99 = vector.load %arg12[%c0_49, %c0_50, %c0_51] : memref<2x1x32xf32, #tpu.memory_space<vmem>>, vector<1x1x32xf32>
    %100 = vector.shape_cast %99 : vector<1x1x32xf32> to vector<1x32xf32>
    %c0_52 = arith.constant 0 : index
    %c0_53 = arith.constant 0 : index
    %c0_54 = arith.constant 0 : index
    %101 = vector.load %arg13[%c0_52, %c0_53, %c0_54] : memref<2x1x32xf32, #tpu.memory_space<vmem>>, vector<1x1x32xf32>
    %102 = vector.shape_cast %101 : vector<1x1x32xf32> to vector<1x32xf32>
    %cst_55 = arith.constant dense<0.000000e+00> : vector<16xf32>
    %103 = vector.multi_reduction <add>, %98, %cst_55 [1] : vector<16x32xf32> to vector<16xf32>
    %104 = vector.shape_cast %103 : vector<16xf32> to vector<16x1xf32>
    %cst_56 = arith.constant 3.200000e+01 : f32
    %105 = vector.broadcast %cst_56 : f32 to vector<16x1xf32>
    %106 = arith.divf %104, %105 : vector<16x1xf32>
    %107 = vector.broadcast %106 : vector<16x1xf32> to vector<16x32xf32>
    %108 = arith.subf %98, %107 : vector<16x32xf32>
    %109 = arith.mulf %108, %108 : vector<16x32xf32>
    %cst_57 = arith.constant dense<0.000000e+00> : vector<16xf32>
    %110 = vector.multi_reduction <add>, %109, %cst_57 [1] : vector<16x32xf32> to vector<16xf32>
    %111 = vector.shape_cast %110 : vector<16xf32> to vector<16x1xf32>
    %cst_58 = arith.constant 3.200000e+01 : f32
    %112 = vector.broadcast %cst_58 : f32 to vector<16x1xf32>
    %113 = arith.divf %111, %112 : vector<16x1xf32>
    %114 = vector.broadcast %106 : vector<16x1xf32> to vector<16x32xf32>
    %115 = arith.subf %98, %114 : vector<16x32xf32>
    %cst_59 = arith.constant 9.99999974E-6 : f32
    %116 = vector.broadcast %cst_59 : f32 to vector<16x1xf32>
    %117 = arith.addf %113, %116 : vector<16x1xf32>
    %118 = math.rsqrt %117 : vector<16x1xf32>
    %119 = vector.broadcast %118 : vector<16x1xf32> to vector<16x32xf32>
    %120 = arith.mulf %115, %119 : vector<16x32xf32>
    %121 = vector.broadcast %100 : vector<1x32xf32> to vector<16x32xf32>
    %122 = arith.mulf %120, %121 : vector<16x32xf32>
    %123 = vector.broadcast %102 : vector<1x32xf32> to vector<16x32xf32>
    %124 = arith.addf %122, %123 : vector<16x32xf32>
    %125 = arith.truncf %124 : vector<16x32xf32> to vector<16x32xbf16>
    %c1 = arith.constant 1 : index
    %c0_60 = arith.constant 0 : index
    %c0_61 = arith.constant 0 : index
    %126 = vector.load %arg2[%c1, %c0_60, %c0_61] : memref<2x32x96xbf16, #tpu.memory_space<vmem>>, vector<1x32x96xbf16>
    %127 = vector.shape_cast %126 : vector<1x32x96xbf16> to vector<32x96xbf16>
    %cst_62 = arith.constant dense<0.000000e+00> : vector<16x96xf32>
    %128 = tpu.matmul %125, %127, %cst_62 {dimension_numbers = #tpu.dot_dimension_numbers<[1], [0], [0], [1], [0, 0, 1, 1], [], []>} : vector<16x32xbf16>, vector<32x96xbf16>, vector<16x96xf32> -> vector<16x96xf32>
    %c1_63 = arith.constant 1 : index
    %c0_64 = arith.constant 0 : index
    %c0_65 = arith.constant 0 : index
    %129 = vector.load %arg3[%c1_63, %c0_64, %c0_65] : memref<2x1x96xf32, #tpu.memory_space<vmem>>, vector<1x1x96xf32>
    %130 = vector.shape_cast %129 : vector<1x1x96xf32> to vector<1x96xf32>
    %131 = vector.broadcast %130 : vector<1x96xf32> to vector<16x96xf32>
    %132 = arith.addf %128, %131 : vector<16x96xf32>
    %133 = arith.truncf %132 : vector<16x96xf32> to vector<16x96xbf16>
    %134 = vector.extract_strided_slice %133 {offsets = [0, 0], sizes = [16, 16], strides = [1, 1]} : vector<16x96xbf16> to vector<16x16xbf16>
    %135 = vector.extract_strided_slice %133 {offsets = [0, 16], sizes = [16, 16], strides = [1, 1]} : vector<16x96xbf16> to vector<16x16xbf16>
    %136 = tpu.concatenate %134, %135 in 0 : vector<16x16xbf16>, vector<16x16xbf16> -> vector<32x16xbf16>
    %137 = vector.extract_strided_slice %133 {offsets = [0, 32], sizes = [16, 16], strides = [1, 1]} : vector<16x96xbf16> to vector<16x16xbf16>
    %138 = vector.extract_strided_slice %133 {offsets = [0, 48], sizes = [16, 16], strides = [1, 1]} : vector<16x96xbf16> to vector<16x16xbf16>
    %139 = tpu.concatenate %137, %138 in 0 : vector<16x16xbf16>, vector<16x16xbf16> -> vector<32x16xbf16>
    %140 = vector.extract_strided_slice %133 {offsets = [0, 64], sizes = [16, 16], strides = [1, 1]} : vector<16x96xbf16> to vector<16x16xbf16>
    %141 = vector.extract_strided_slice %133 {offsets = [0, 80], sizes = [16, 16], strides = [1, 1]} : vector<16x96xbf16> to vector<16x16xbf16>
    %142 = tpu.concatenate %140, %141 in 0 : vector<16x16xbf16>, vector<16x16xbf16> -> vector<32x16xbf16>
    %cst_66 = arith.constant dense<0.000000e+00> : vector<32x32xf32>
    %143 = tpu.matmul %136, %139, %cst_66 {dimension_numbers = #tpu.dot_dimension_numbers<[1], [1], [0], [0], [0, 0, 1, 0], [], []>} : vector<32x16xbf16>, vector<32x16xbf16>, vector<32x32xf32> -> vector<32x32xf32>
    %cst_67 = arith.constant 2.500000e-01 : f32
    %144 = vector.broadcast %cst_67 : f32 to vector<32x32xf32>
    %145 = arith.mulf %143, %144 : vector<32x32xf32>
    %146 = arith.addf %145, %1 : vector<32x32xf32>
    %cst_68 = arith.constant dense<0xFF800000> : vector<32xf32>
    %147 = vector.multi_reduction <maximumf>, %146, %cst_68 [1] : vector<32x32xf32> to vector<32xf32>
    %148 = vector.shape_cast %147 : vector<32xf32> to vector<32x1xf32>
    %149 = vector.broadcast %148 : vector<32x1xf32> to vector<32x32xf32>
    %150 = arith.subf %146, %149 : vector<32x32xf32>
    %151 = math.exp %150 : vector<32x32xf32>
    %cst_69 = arith.constant dense<0.000000e+00> : vector<32xf32>
    %152 = vector.multi_reduction <add>, %151, %cst_69 [1] : vector<32x32xf32> to vector<32xf32>
    %153 = vector.shape_cast %152 : vector<32xf32> to vector<32x1xf32>
    %154 = tpu.reciprocal %153 {approx = true} : vector<32x1xf32> -> vector<32x1xf32>
    %155 = vector.broadcast %154 : vector<32x1xf32> to vector<32x32xf32>
    %156 = arith.mulf %151, %155 : vector<32x32xf32>
    %157 = arith.truncf %156 : vector<32x32xf32> to vector<32x32xbf16>
    %cst_70 = arith.constant dense<0.000000e+00> : vector<32x16xf32>
    %158 = tpu.matmul %157, %142, %cst_70 {dimension_numbers = #tpu.dot_dimension_numbers<[1], [0], [0], [1], [0, 0, 1, 1], [], []>} : vector<32x32xbf16>, vector<32x16xbf16>, vector<32x16xf32> -> vector<32x16xf32>
    %c1_71 = arith.constant 1 : index
    %c0_72 = arith.constant 0 : index
    %c0_73 = arith.constant 0 : index
    %159 = vector.load %arg4[%c1_71, %c0_72, %c0_73] : memref<2x32x32xbf16, #tpu.memory_space<vmem>>, vector<1x32x32xbf16>
    %160 = vector.shape_cast %159 : vector<1x32x32xbf16> to vector<32x32xbf16>
    %cst_74 = arith.constant 0.000000e+00 : f32
    %161 = vector.broadcast %cst_74 : f32 to vector<16x32xf32>
    %162 = vector.extract_strided_slice %158 {offsets = [0, 0], sizes = [16, 16], strides = [1, 1]} : vector<32x16xf32> to vector<16x16xf32>
    %163 = arith.truncf %162 : vector<16x16xf32> to vector<16x16xbf16>
    %164 = vector.extract_strided_slice %160 {offsets = [0, 0], sizes = [16, 32], strides = [1, 1]} : vector<32x32xbf16> to vector<16x32xbf16>
    %cst_75 = arith.constant dense<0.000000e+00> : vector<16x32xf32>
    %165 = tpu.matmul %163, %164, %cst_75 {dimension_numbers = #tpu.dot_dimension_numbers<[1], [0], [0], [1], [0, 0, 1, 1], [], []>} : vector<16x16xbf16>, vector<16x32xbf16>, vector<16x32xf32> -> vector<16x32xf32>
    %166 = arith.addf %161, %165 : vector<16x32xf32>
    %167 = vector.extract_strided_slice %158 {offsets = [16, 0], sizes = [16, 16], strides = [1, 1]} : vector<32x16xf32> to vector<16x16xf32>
    %168 = arith.truncf %167 : vector<16x16xf32> to vector<16x16xbf16>
    %169 = vector.extract_strided_slice %160 {offsets = [16, 0], sizes = [16, 32], strides = [1, 1]} : vector<32x32xbf16> to vector<16x32xbf16>
    %cst_76 = arith.constant dense<0.000000e+00> : vector<16x32xf32>
    %170 = tpu.matmul %168, %169, %cst_76 {dimension_numbers = #tpu.dot_dimension_numbers<[1], [0], [0], [1], [0, 0, 1, 1], [], []>} : vector<16x16xbf16>, vector<16x32xbf16>, vector<16x32xf32> -> vector<16x32xf32>
    %171 = arith.addf %166, %170 : vector<16x32xf32>
    %c1_77 = arith.constant 1 : index
    %c0_78 = arith.constant 0 : index
    %c0_79 = arith.constant 0 : index
    %172 = vector.load %arg5[%c1_77, %c0_78, %c0_79] : memref<2x1x32xf32, #tpu.memory_space<vmem>>, vector<1x1x32xf32>
    %173 = vector.shape_cast %172 : vector<1x1x32xf32> to vector<1x32xf32>
    %174 = vector.broadcast %173 : vector<1x32xf32> to vector<16x32xf32>
    %175 = arith.addf %171, %174 : vector<16x32xf32>
    %176 = arith.addf %124, %175 : vector<16x32xf32>
    %c1_80 = arith.constant 1 : index
    %c0_81 = arith.constant 0 : index
    %c0_82 = arith.constant 0 : index
    %177 = vector.load %arg6[%c1_80, %c0_81, %c0_82] : memref<2x1x32xf32, #tpu.memory_space<vmem>>, vector<1x1x32xf32>
    %178 = vector.shape_cast %177 : vector<1x1x32xf32> to vector<1x32xf32>
    %c1_83 = arith.constant 1 : index
    %c0_84 = arith.constant 0 : index
    %c0_85 = arith.constant 0 : index
    %179 = vector.load %arg7[%c1_83, %c0_84, %c0_85] : memref<2x1x32xf32, #tpu.memory_space<vmem>>, vector<1x1x32xf32>
    %180 = vector.shape_cast %179 : vector<1x1x32xf32> to vector<1x32xf32>
    %cst_86 = arith.constant dense<0.000000e+00> : vector<16xf32>
    %181 = vector.multi_reduction <add>, %176, %cst_86 [1] : vector<16x32xf32> to vector<16xf32>
    %182 = vector.shape_cast %181 : vector<16xf32> to vector<16x1xf32>
    %cst_87 = arith.constant 3.200000e+01 : f32
    %183 = vector.broadcast %cst_87 : f32 to vector<16x1xf32>
    %184 = arith.divf %182, %183 : vector<16x1xf32>
    %185 = vector.broadcast %184 : vector<16x1xf32> to vector<16x32xf32>
    %186 = arith.subf %176, %185 : vector<16x32xf32>
    %187 = arith.mulf %186, %186 : vector<16x32xf32>
    %cst_88 = arith.constant dense<0.000000e+00> : vector<16xf32>
    %188 = vector.multi_reduction <add>, %187, %cst_88 [1] : vector<16x32xf32> to vector<16xf32>
    %189 = vector.shape_cast %188 : vector<16xf32> to vector<16x1xf32>
    %cst_89 = arith.constant 3.200000e+01 : f32
    %190 = vector.broadcast %cst_89 : f32 to vector<16x1xf32>
    %191 = arith.divf %189, %190 : vector<16x1xf32>
    %192 = vector.broadcast %184 : vector<16x1xf32> to vector<16x32xf32>
    %193 = arith.subf %176, %192 : vector<16x32xf32>
    %cst_90 = arith.constant 9.99999974E-6 : f32
    %194 = vector.broadcast %cst_90 : f32 to vector<16x1xf32>
    %195 = arith.addf %191, %194 : vector<16x1xf32>
    %196 = math.rsqrt %195 : vector<16x1xf32>
    %197 = vector.broadcast %196 : vector<16x1xf32> to vector<16x32xf32>
    %198 = arith.mulf %193, %197 : vector<16x32xf32>
    %199 = vector.broadcast %178 : vector<1x32xf32> to vector<16x32xf32>
    %200 = arith.mulf %198, %199 : vector<16x32xf32>
    %201 = vector.broadcast %180 : vector<1x32xf32> to vector<16x32xf32>
    %202 = arith.addf %200, %201 : vector<16x32xf32>
    %203 = arith.truncf %202 : vector<16x32xf32> to vector<16x32xbf16>
    %c1_91 = arith.constant 1 : index
    %c0_92 = arith.constant 0 : index
    %c0_93 = arith.constant 0 : index
    %204 = vector.load %arg8[%c1_91, %c0_92, %c0_93] : memref<2x32x64xbf16, #tpu.memory_space<vmem>>, vector<1x32x64xbf16>
    %205 = vector.shape_cast %204 : vector<1x32x64xbf16> to vector<32x64xbf16>
    %cst_94 = arith.constant dense<0.000000e+00> : vector<16x64xf32>
    %206 = tpu.matmul %203, %205, %cst_94 {dimension_numbers = #tpu.dot_dimension_numbers<[1], [0], [0], [1], [0, 0, 1, 1], [], []>} : vector<16x32xbf16>, vector<32x64xbf16>, vector<16x64xf32> -> vector<16x64xf32>
    %c1_95 = arith.constant 1 : index
    %c0_96 = arith.constant 0 : index
    %c0_97 = arith.constant 0 : index
    %207 = vector.load %arg9[%c1_95, %c0_96, %c0_97] : memref<2x1x64xf32, #tpu.memory_space<vmem>>, vector<1x1x64xf32>
    %208 = vector.shape_cast %207 : vector<1x1x64xf32> to vector<1x64xf32>
    %209 = vector.broadcast %208 : vector<1x64xf32> to vector<16x64xf32>
    %210 = arith.addf %206, %209 : vector<16x64xf32>
    %cst_98 = arith.constant 0.000000e+00 : f32
    %211 = vector.broadcast %cst_98 : f32 to vector<16x64xf32>
    %212 = arith.maximumf %210, %211 : vector<16x64xf32>
    %213 = arith.truncf %212 : vector<16x64xf32> to vector<16x64xbf16>
    %c1_99 = arith.constant 1 : index
    %c0_100 = arith.constant 0 : index
    %c0_101 = arith.constant 0 : index
    %214 = vector.load %arg10[%c1_99, %c0_100, %c0_101] : memref<2x64x32xbf16, #tpu.memory_space<vmem>>, vector<1x64x32xbf16>
    %215 = vector.shape_cast %214 : vector<1x64x32xbf16> to vector<64x32xbf16>
    %cst_102 = arith.constant dense<0.000000e+00> : vector<16x32xf32>
    %216 = tpu.matmul %213, %215, %cst_102 {dimension_numbers = #tpu.dot_dimension_numbers<[1], [0], [0], [1], [0, 0, 1, 1], [], []>} : vector<16x64xbf16>, vector<64x32xbf16>, vector<16x32xf32> -> vector<16x32xf32>
    %c1_103 = arith.constant 1 : index
    %c0_104 = arith.constant 0 : index
    %c0_105 = arith.constant 0 : index
    %217 = vector.load %arg11[%c1_103, %c0_104, %c0_105] : memref<2x1x32xf32, #tpu.memory_space<vmem>>, vector<1x1x32xf32>
    %218 = vector.shape_cast %217 : vector<1x1x32xf32> to vector<1x32xf32>
    %219 = vector.broadcast %218 : vector<1x32xf32> to vector<16x32xf32>
    %220 = arith.addf %216, %219 : vector<16x32xf32>
    %221 = arith.addf %202, %220 : vector<16x32xf32>
    %c1_106 = arith.constant 1 : index
    %c0_107 = arith.constant 0 : index
    %c0_108 = arith.constant 0 : index
    %222 = vector.load %arg12[%c1_106, %c0_107, %c0_108] : memref<2x1x32xf32, #tpu.memory_space<vmem>>, vector<1x1x32xf32>
    %223 = vector.shape_cast %222 : vector<1x1x32xf32> to vector<1x32xf32>
    %c1_109 = arith.constant 1 : index
    %c0_110 = arith.constant 0 : index
    %c0_111 = arith.constant 0 : index
    %224 = vector.load %arg13[%c1_109, %c0_110, %c0_111] : memref<2x1x32xf32, #tpu.memory_space<vmem>>, vector<1x1x32xf32>
    %225 = vector.shape_cast %224 : vector<1x1x32xf32> to vector<1x32xf32>
    %cst_112 = arith.constant dense<0.000000e+00> : vector<16xf32>
    %226 = vector.multi_reduction <add>, %221, %cst_112 [1] : vector<16x32xf32> to vector<16xf32>
    %227 = vector.shape_cast %226 : vector<16xf32> to vector<16x1xf32>
    %cst_113 = arith.constant 3.200000e+01 : f32
    %228 = vector.broadcast %cst_113 : f32 to vector<16x1xf32>
    %229 = arith.divf %227, %228 : vector<16x1xf32>
    %230 = vector.broadcast %229 : vector<16x1xf32> to vector<16x32xf32>
    %231 = arith.subf %221, %230 : vector<16x32xf32>
    %232 = arith.mulf %231, %231 : vector<16x32xf32>
    %cst_114 = arith.constant dense<0.000000e+00> : vector<16xf32>
    %233 = vector.multi_reduction <add>, %232, %cst_114 [1] : vector<16x32xf32> to vector<16xf32>
    %234 = vector.shape_cast %233 : vector<16xf32> to vector<16x1xf32>
    %cst_115 = arith.constant 3.200000e+01 : f32
    %235 = vector.broadcast %cst_115 : f32 to vector<16x1xf32>
    %236 = arith.divf %234, %235 : vector<16x1xf32>
    %237 = vector.broadcast %229 : vector<16x1xf32> to vector<16x32xf32>
    %238 = arith.subf %221, %237 : vector<16x32xf32>
    %cst_116 = arith.constant 9.99999974E-6 : f32
    %239 = vector.broadcast %cst_116 : f32 to vector<16x1xf32>
    %240 = arith.addf %236, %239 : vector<16x1xf32>
    %241 = math.rsqrt %240 : vector<16x1xf32>
    %242 = vector.broadcast %241 : vector<16x1xf32> to vector<16x32xf32>
    %243 = arith.mulf %238, %242 : vector<16x32xf32>
    %244 = vector.broadcast %223 : vector<1x32xf32> to vector<16x32xf32>
    %245 = arith.mulf %243, %244 : vector<16x32xf32>
    %246 = vector.broadcast %225 : vector<1x32xf32> to vector<16x32xf32>
    %247 = arith.addf %245, %246 : vector<16x32xf32>
    %248 = arith.truncf %247 : vector<16x32xf32> to vector<16x32xbf16>
    %c0_117 = arith.constant 0 : index
    %c0_118 = arith.constant 0 : index
    %249 = vector.load %arg14[%c0_117, %c0_118] : memref<32x128xbf16, #tpu.memory_space<vmem>>, vector<32x128xbf16>
    %cst_119 = arith.constant dense<0.000000e+00> : vector<16x128xf32>
    %250 = tpu.matmul %248, %249, %cst_119 {dimension_numbers = #tpu.dot_dimension_numbers<[1], [0], [0], [1], [0, 0, 1, 1], [], []>} : vector<16x32xbf16>, vector<32x128xbf16>, vector<16x128xf32> -> vector<16x128xf32>
    %c0_120 = arith.constant 0 : index
    %c0_121 = arith.constant 0 : index
    %251 = vector.load %arg15[%c0_120, %c0_121] : memref<1x128xf32, #tpu.memory_space<vmem>>, vector<1x128xf32>
    %252 = vector.broadcast %251 : vector<1x128xf32> to vector<16x128xf32>
    %253 = arith.addf %250, %252 : vector<16x128xf32>
    %c0_122 = arith.constant 0 : index
    %c0_123 = arith.constant 0 : index
    %254 = vector.load %arg16[%c0_122, %c0_123] : memref<16x128xf32, #tpu.memory_space<vmem>>, vector<16x128xf32>
    tpu.vector_store %arg16[%c0_122, %c0_123], %253 {strides = array<i32>} : memref<16x128xf32, #tpu.memory_space<vmem>>, vector<16x128xf32>,
    return
  }
}

</mosaic_0001>

<bundles_post_ra>
// kernel: transformer_forward.1
= control target key start
LH: loop header
LB: loop body
LE: loop exit
PB: predicated region body
PF: predicated region fallthrough
CT: control target
= control target key end

     0   :  { %s2141_s0 = inlined_call_operand.vmem [shape: f32[16,32], index: 0, kind: input, shape index: {}]   ;;  %s2142_s1 = inlined_call_operand.vmem [shape: f32[32,32], index: 1, kind: input, shape index: {}]   ;;  %s2143_s2 = inlined_call_operand.vmem [shape: bf16[2,32,96], index: 2, kind: input, shape index: {}]   ;;  %s2144_s3 = inlined_call_operand.vmem [shape: f32[2,1,96], index: 3, kind: input, shape index: {}]   ;;  %s2145_s4 = inlined_call_operand.vmem [shape: bf16[2,32,32], index: 4, kind: input, shape index: {}]   ;;  %s2146_s5 = inlined_call_operand.vmem [shape: f32[2,1,32], index: 5, kind: input, shape index: {}]   ;;  %s2147_s6 = inlined_call_operand.vmem [shape: f32[2,1,32], index: 6, kind: input, shape index: {}]   ;;  %s2148_s7 = inlined_call_operand.vmem [shape: f32[2,1,32], index: 7, kind: input, shape index: {}]   ;;  %s2149_s8 = inlined_call_operand.vmem [shape: bf16[2,32,64], index: 8, kind: input, shape index: {}]   ;;  %s2150_s9 = inlined_call_operand.vmem [shape: f32[2,1,64], index: 9, kind: input, shape index: {}]   ;;  %s2151_s10 = inlined_call_operand.vmem [shape: bf16[2,64,32], index: 10, kind: input, shape index: {}]   ;;  %s2152_s11 = inlined_call_operand.vmem [shape: f32[2,1,32], index: 11, kind: input, shape index: {}]   ;;  %s2153_s12 = inlined_call_operand.vmem [shape: f32[2,1,32], index: 12, kind: input, shape index: {}]   ;;  %s2154_s13 = inlined_call_operand.vmem [shape: f32[2,1,32], index: 13, kind: input, shape index: {}]   ;;  %s2155_s14 = inlined_call_operand.vmem [shape: bf16[32,128], index: 14, kind: input, shape index: {}]   ;;  %s2156_s15 = inlined_call_operand.vmem [shape: f32[1,128], index: 15, kind: input, shape index: {}]   ;;  %s2157_s16 = inlined_call_operand.hbm [shape: f32[16,128], index: 16, kind: output, shape index: {}]  }
   0x1   :  { %2159 = sst [smem:[#allocation5_spill]] %s2141_s0 }
   0x2   :  { %v1656_v0 = vld [vmem:[%s2143_s2 + $0x8] sm:$0xff]   ;;  %v1748_v1 = vmov 0.0   ;;  %v1657_v2 = vld [vmem:[%s2143_s2] sm:$0xff]   ;;  %vm1749_vm0 = vmmov 0   ;;  %s2160_s27 = sld [smem:[#allocation5_spill]]  ;;  %vm85_vm1 = vcmask 261120  }
   0x3   :  { %1524 = vmatprep.subr.bf16.mxu0 %v1748_v1  ;;  %1528 = vmatprep.mubr.msk.bf16.mxu0 %vm1749_vm0, %v1748_v1 }
   0x4   :  { %1525 = vmatpush3.bf16.msra.mxu0 %v1656_v0 }
   0x5   :  { %1526 = vmatprep.subr.bf16.mxu0 %v1748_v1 }
   0x8   :  { %v1853_v3 = vld [vmem:[%s2160_s27] sm:$0xff]  ;;  %v1858_v4 = vld [vmem:[%s2160_s27 + $0x8] sm:$0xff]  ;;  %1527 = vmatpush3.bf16.msra.mxu0 %v1657_v2 }
   0x9   :  { %v61_v5 = vpack.c.bf16 %v1858_v4, %v1853_v3 }
   0xb   :  { %1529 = vmatmul.mubr.msk.bf16.vlgmr.msra.gmra.mxu0 %vm85_vm1, %v61_v5 }
   0xc   :  { %21 = vsyncpa [#allocation3], 0  ;;  %v1389_v7 = vld [vmem:[%s2144_s3] ss:$0 sm:$0xff]  ;;  %vm138_vm2 = vcmask 130048   ;;  %s1750_s17 = smov 96  }
   0xd   :  { %s1751_s18 = smov 112   ;;  %v1891_v21 = vld [vmem:[%s2142_s1] sm:$0xff]  ;;  %v1896_v24 = vld [vmem:[%s2142_s1 + $0x18] sm:$0xff]  ;;  %v1902_v28 = vld [vmem:[%s2142_s1 + $0x8] sm:$0xff]  ;;  %vm587_vm3 = vcmask 523264  }
   0xe   :  { %v1909_v33 = vld [vmem:[%s2142_s1 + $0x10] sm:$0xff]  ;;  %s1752_s1 = smov 64  }
  0xcb   :  { %v123_v6 = vpop.f32.mrf.mxu0 }
  0xcc   :  { %v124_v10 = vadd.f32 %v1389_v7, %v123_v6 }
  0xcd   :  { %v1530_v8 = vpop.f32.mrf.mxu0 }
  0xcf   :  { %v126_v9 = vpop.f32.mrf.mxu0 }
  0xd0   :  { %v127_v11 = vadd.f32 %v1389_v7, %v126_v9 }
  0xd1   :  { %v1531_v12 = vpop.f32.mrf.mxu0 }
  0xd2   :  { %v1867_v13 = vpack.c.bf16 %v127_v11, %v124_v10 }
  0xd4   :  { %134 = vrot.lane.b32.xlu1 %v1867_v13, %s1750_s17  ;;  %132 = vrot.lane.b32.xlu0 %v1867_v13, %s1751_s18 }
  0xd5   :  { %1536 = vmatprep.mubr.msk.bf16.mxu1 %vm138_vm2, %v1867_v13 }
 0x146   :  { %v1875_v14 = vpop.permute.xlu0 %132  ;;  %v135_v17 = vpop.permute.xlu1 %134 }
 0x147   :  { %136 = vrot.lane.b32.xlu0 %v1875_v14, %s1750_s17  ;;  %v146_v18 = vsel %vm138_vm2, %v135_v17, 0 }
 0x1b9   :  { %v137_v15 = vpop.permute.xlu0 %136 }
 0x1ba   :  { %1644 = vmatprep.subr.msk.bf16.mxu1 %vm138_vm2, %v137_v15  ;;  %v149_v16 = vsel %vm138_vm2, %v137_v15, 0  ;;  %v1659_v15 = vld [vmem:[%s2145_s4] sm:$0xff]  }
 0x1bb   :  { %1533 = vmatpush3.bf16.xpose.msra.mxu1 %v149_v16 }
 0x1bc   :  { %1645 = vmatprep.subr.msk.bf16.mxu1 %vm138_vm2, %v135_v17 }
 0x1c3   :  { %1535 = vmatpush3.bf16.xpose.msra.mxu1 %v146_v18 }
 0x1c4   :  { %1554 = vmatprep.subr.bf16.mxu1 %v1748_v1 }
 0x1ca   :  { %1537 = vmatmul.mubr.msk.bf16.vlgmr.msra.gmra.mxu1 %vm138_vm2, %v1875_v14 }
 0x1cb   :  { %1556 = vmatprep.mubr.msk.bf16.mxu1 %vm1749_vm0, %v1748_v1  ;;  %1555 = vmatpush3.bf16.msra.mxu1 %v1659_v15 }
 0x1cc   :  { %1568 = vmatprep.subr.bf16.mxu1 %v1748_v1 }
 0x28a   :  { %v1538_v19 = vpop.f32.mrf.mxu1 }
 0x28b   :  { %v202_v29 = vmul.f32 0.25, %v1538_v19 }
 0x28c   :  { %v185_v20 = vpop.f32.mrf.mxu1 }
 0x28d   :  { %v200_v22 = vmul.f32 0.25, %v185_v20  ;;  %v206_v37 = vadd.f32 %v202_v29, %v1909_v33 }
 0x28e   :  { %v1539_v23 = vpop.f32.mrf.mxu1 }
 0x28f   :  { %v203_v25 = vmul.f32 0.25, %v1539_v23  ;;  %v204_v26 = vadd.f32 %v200_v22, %v1891_v21  ;;  %v214_v38 = vsel %vm85_vm1, %v206_v37, -inf }
 0x290   :  { %v188_v27 = vpop.f32.mrf.mxu1 }
 0x291   :  { %v201_v30 = vmul.f32 0.25, %v188_v27  ;;  %v208_v31 = vsel %vm85_vm1, %v204_v26, -inf  ;;  %v207_v32 = vadd.f32 %v203_v25, %v1896_v24  ;;  %v1401_v27 = vld [vmem:[%s2146_s5] ss:$0 sm:$0xff] }
 0x292   :  { %209 = vmax.xlane.f32.xlu1 %v208_v31 }
 0x293   :  { %v205_v34 = vadd.f32 %v201_v30, %v1902_v28  ;;  %v217_v35 = vsel %vm85_vm1, %v207_v32, -inf }
 0x295   :  { %v211_v36 = vsel %vm85_vm1, %v205_v34, -inf }
 0x296   :  { %218 = vmax.xlane.f32.xlu1 %v217_v35  ;;  %212 = vmax.xlane.f32.xlu0 %v211_v36 }
 0x29a   :  { %215 = vmax.xlane.f32.xlu0 %v214_v38 }
 0x31b   :  { %v210_v39 = vpop.xlane.xlu1 %209 }
 0x31c   :  { %v220_v44 = vsub.f32 %v204_v26, %v210_v39 }
 0x31e   :  { %v224_v49 = vmul.f32 1.442695, %v220_v44 }
 0x31f   :  { %v219_v40 = vpop.xlane.xlu1 %218  ;;  %v213_v41 = vpop.xlane.xlu0 %212 }
 0x320   :  { %v223_v42 = vsub.f32 %v207_v32, %v219_v40  ;;  %v221_v43 = vsub.f32 %v205_v34, %v213_v41 }
 0x322   :  { %v230_v45 = vmul.f32 1.442695, %v223_v42  ;;  %v226_v46 = vmul.f32 1.442695, %v221_v43 }
 0x323   :  { %v216_v47 = vpop.xlane.xlu0 %215 }
 0x324   :  { %1678 = vpow2.f32 %v230_v45  ;;  %v222_v48 = vsub.f32 %v206_v37, %v216_v47 }
 0x325   :  { %1680 = vpow2.f32 %v226_v46 }
 0x326   :  { %v228_v50 = vmul.f32 1.442695, %v222_v48 }
 0x328   :  { %1682 = vpow2.f32 %v228_v50 }
 0x329   :  { %1684 = vpow2.f32 %v224_v49 }
 0x331   :  { %v1679_v51 = vpop.eup %1678 }
 0x332   :  { %v241_v52 = vsel %vm85_vm1, %v1679_v51, 0.0  ;;  %v1681_v53 = vpop.eup %1680 }
 0x333   :  { %242 = vadd.xlane.f32.xlu1 %v241_v52  ;;  %v235_v55 = vsel %vm85_vm1, %v1681_v53, 0.0  ;;  %v1661_v52 = vld [vmem:[%s2149_s8] sm:$0xff]  }
 0x335   :  { %v1683_v54 = vpop.eup %1682 }
 0x336   :  { %v238_v56 = vsel %vm85_vm1, %v1683_v54, 0.0  ;;  %v1685_v57 = vpop.eup %1684 }
 0x337   :  { %236 = vadd.xlane.f32.xlu1 %v235_v55  ;;  %239 = vadd.xlane.f32.xlu0 %v238_v56  ;;  %v232_v58 = vsel %vm85_vm1, %v1685_v57, 0.0 }
 0x33b   :  { %233 = vadd.xlane.f32.xlu0 %v232_v58 }
 0x348   :  { %254 = vrot.lane.b32.xlu1 %v1867_v13, %s1752_s1 }
 0x351   :  { %256 = vrot.lane.b32.xlu0 %v1875_v14, %s1752_s1  ;;  %v1658_v14 = vld [vmem:[%s2145_s4 + $0x8] sm:$0xff]  }
 0x3bc   :  { %v243_v59 = vpop.xlane.xlu1 %242 }
 0x3c0   :  { %v237_v60 = vpop.xlane.xlu1 %236  ;;  %v240_v61 = vpop.xlane.xlu0 %239 }
 0x3c1   :  { %1686 = vrcp.f32 %v240_v61 }
 0x3c2   :  { %1688 = vrcp.f32 %v237_v60 }
 0x3c3   :  { %1690 = vrcp.f32 %v243_v59 }
 0x3c4   :  { %v234_v62 = vpop.xlane.xlu0 %233  ;;  %v255_v0 = vpop.permute.xlu1 %254 }
 0x3c5   :  { %1692 = vrcp.f32 %v234_v62  ;;  %v1402_v62 = vld [vmem:[%s2147_s6] ss:$0 sm:$0xff] }
 0x3c8   :  { %v257_v63 = vpop.permute.xlu0 %256 }
 0x3c9   :  { %1540 = vmatprep.subr.bf16.mxu0 %v257_v63 }
 0x3ca   :  { %1541 = vmatpush3.bf16.msra.mxu0 %v257_v63 }
 0x3cb   :  { %1542 = vmatprep.subr.bf16.mxu0 %v255_v0 }
 0x3ce   :  { %1543 = vmatpush3.bf16.msra.mxu0 %v255_v0  ;;  %v1687_v2 = vpop.eup %1686 }
 0x3cf   :  { %1548 = vmatprep.subr.bf16.mxu0 %v1748_v1  ;;  %v1689_v5 = vpop.eup %1688  ;;  %v250_v8 = vmul.f32 %v1687_v2, %v1683_v54 }
 0x3d0   :  { %v1691_v6 = vpop.eup %1690  ;;  %v249_v10 = vmul.f32 %v1689_v5, %v1681_v53  ;;  %v1662_v53 = vld [vmem:[%s2151_s10 + $0x18] sm:$0xff]   ;;  %v1403_v5 = vld [vmem:[%s2148_s7] ss:$0 sm:$0xff] }
 0x3d1   :  { %v251_v11 = vmul.f32 %v1691_v6, %v1679_v51 }
 0x3d2   :  { %v1693_v7 = vpop.eup %1692 }
 0x3d3   :  { %v248_v9 = vmul.f32 %v1693_v7, %v1685_v57  ;;  %v253_v13 = vpack.c.bf16 %v251_v11, %v250_v8  ;;  %v1664_v11 = vld [vmem:[%s2151_s10 + $0x8] sm:$0xff]  }
 0x3d5   :  { %v252_v12 = vpack.c.bf16 %v249_v10, %v248_v9  ;;  %v1663_v10 = vld [vmem:[%s2151_s10 + $0x10] sm:$0xff]  }
 0x3d7   :  { %1544 = vmatprep.mubr.msk.bf16.mxu0 %vm85_vm1, %v252_v12  ;;  %v1665_v12 = vld [vmem:[%s2151_s10] sm:$0xff]  }
 0x3d8   :  { %1545 = vmatmul.mubr.msk.bf16.vlgmr.msra.gmra.mxu0 %vm85_vm1, %v253_v13  ;;  %v1404_v13 = vld [vmem:[%s2150_s9] ss:$0 sm:$0xff] }
 0x3d9   :  { %1550 = vmatprep.mubr.msk.bf16.mxu0 %vm1749_vm0, %v1748_v1  ;;  %1549 = vmatpush3.bf16.msra.mxu0 %v1658_v14 }
 0x3da   :  { %1560 = vmatprep.subr.bf16.mxu0 %v1748_v1 }
 0x498   :  { %v1546_v16 = vpop.f32.mrf.mxu0 }
 0x49a   :  { %v300_v17 = vpop.f32.mrf.mxu0 }
 0x49c   :  { %v1547_v18 = vpop.f32.mrf.mxu0 }
 0x49d   :  { %v320_v19 = vpack.c.bf16 %v1547_v18, %v1546_v16 }
 0x49e   :  { %v303_v20 = vpop.f32.mrf.mxu0 }
 0x49f   :  { %v319_v22 = vpack.c.bf16 %v303_v20, %v300_v17  ;;  %1551 = vmatmul.mubr.msk.bf16.vlgmr.msra.gmra.mxu0 %vm138_vm2, %v320_v19 }
 0x4a0   :  { %1564 = vmatprep.mubr.msk.bf16.mxu0 %vm1749_vm0, %v1748_v1 }
 0x4a1   :  { %1557 = vmatmul.mubr.msk.bf16.vlgmr.msra.gmra.mxu1 %vm138_vm2, %v319_v22 }
 0x4a2   :  { %1576 = vmatprep.mubr.msk.bf16.mxu1 %vm1749_vm0, %v1748_v1  ;;  %1569 = vmatpush3.bf16.msra.mxu1 %v1662_v53 }
 0x4a3   :  { %1570 = vmatprep.subr.bf16.mxu1 %v1748_v1 }
 0x4a6   :  { %1571 = vmatpush3.bf16.msra.mxu1 %v1663_v10 }
 0x4a7   :  { %1572 = vmatprep.subr.bf16.mxu1 %v1748_v1 }
 0x4aa   :  { %1573 = vmatpush3.bf16.msra.mxu1 %v1664_v11 }
 0x4ab   :  { %1574 = vmatprep.subr.bf16.mxu1 %v1748_v1 }
 0x4ae   :  { %1575 = vmatpush3.bf16.msra.mxu1 %v1665_v12 }
 0x55f   :  { %v364_v23 = vpop.f32.mrf.mxu0 }
 0x561   :  { %v1552_v25 = vpop.f32.mrf.mxu0  ;;  %v414_v26 = vpop.f32.mrf.mxu1 }
 0x562   :  { %v415_v29 = vadd.f32 %v414_v26, %v364_v23  ;;  %v1408_v25 = vld [vmem:[%s2152_s11] ss:$0 sm:$0xff] }
 0x563   :  { %v367_v30 = vpop.f32.mrf.mxu0  ;;  %v1558_v31 = vpop.f32.mrf.mxu1 }
 0x564   :  { %v428_v32 = vadd.f32 %v1401_v27, %v415_v29 }
 0x565   :  { %v1553_v34 = vpop.f32.mrf.mxu0  ;;  %v417_v35 = vpop.f32.mrf.mxu1 }
 0x566   :  { %v418_v36 = vadd.f32 %v417_v35, %v367_v30  ;;  %v430_v37 = vadd.f32 %v428_v32, %v1853_v3 }
 0x567   :  { %v1559_v38 = vpop.f32.mrf.mxu1 }
 0x568   :  { %v429_v39 = vadd.f32 %v1401_v27, %v418_v36  ;;  %v434_v40 = vsel %vm85_vm1, %v430_v37, 0.0 }
 0x569   :  { %435 = vadd.xlane.f32.xlu1 %v434_v40 }
 0x56a   :  { %v431_v41 = vadd.f32 %v429_v39, %v1858_v4  ;;  %v1660_v4 = vld [vmem:[%s2149_s8 + $0x8] sm:$0xff]  }
 0x56b   :  { %1561 = vmatpush3.bf16.msra.mxu0 %v1660_v4 }
 0x56c   :  { %v437_v42 = vsel %vm85_vm1, %v431_v41, 0.0  ;;  %1562 = vmatprep.subr.bf16.mxu0 %v1748_v1 }
 0x56d   :  { %438 = vadd.xlane.f32.xlu0 %v437_v42 }
 0x56f   :  { %1563 = vmatpush3.bf16.msra.mxu0 %v1661_v52 }
 0x570   :  { %1580 = vmatprep.subr.bf16.mxu0 %v1748_v1 }
 0x5f2   :  { %v436_v43 = vpop.xlane.xlu1 %435 }
 0x5f3   :  { %v441_v44 = vmul.f32 0.03125, %v436_v43 }
 0x5f5   :  { %v443_v45 = vsub.f32 %v430_v37, %v441_v44 }
 0x5f6   :  { %v439_v46 = vpop.xlane.xlu0 %438 }
 0x5f7   :  { %v442_v47 = vmul.f32 0.03125, %v439_v46  ;;  %v445_v48 = vmul.f32 %v443_v45, %v443_v45 }
 0x5f9   :  { %v444_v49 = vsub.f32 %v431_v41, %v442_v47  ;;  %v447_v50 = vsel %vm85_vm1, %v445_v48, 0.0  ;;  %v1666_v48 = vld [vmem:[%s2143_s2 + $0x18] sm:$0xff]  }
 0x5fa   :  { %448 = vadd.xlane.f32.xlu0 %v447_v50 }
 0x5fb   :  { %v446_v3 = vmul.f32 %v444_v49, %v444_v49 }
 0x5fd   :  { %v450_v51 = vsel %vm85_vm1, %v446_v3, 0.0 }
 0x5fe   :  { %451 = vadd.xlane.f32.xlu1 %v450_v51 }
 0x683   :  { %v449_v54 = vpop.xlane.xlu0 %448 }
 0x684   :  { %v453_v55 = vmul.f32 0.03125, %v449_v54 }
 0x686   :  { %v455_v56 = vadd.f32 1e-05, %v453_v55 }
 0x687   :  { %v452_v57 = vpop.xlane.xlu1 %451 }
 0x688   :  { %1694 = vrsqrt.f32 %v455_v56  ;;  %v454_v58 = vmul.f32 0.03125, %v452_v57  ;;  %v1414_v56 = vld [vmem:[%s2153_s12] ss:$0 sm:$0xff] }
 0x68a   :  { %v456_v59 = vadd.f32 1e-05, %v454_v58 }
 0x68c   :  { %1696 = vrsqrt.f32 %v456_v59 }
 0x695   :  { %v1695_v60 = vpop.eup %1694 }
 0x696   :  { %v459_v61 = vmul.f32 %v1695_v60, %v443_v45  ;;  %v1415_v60 = vld [vmem:[%s2154_s13] ss:$0 sm:$0xff] }
 0x698   :  { %v467_v2 = vmul.f32 %v1402_v62, %v459_v61 }
 0x699   :  { %v1697_v63 = vpop.eup %1696 }
 0x69a   :  { %v460_v0 = vmul.f32 %v1697_v63, %v444_v49  ;;  %v475_v7 = vadd.f32 %v1403_v5, %v467_v2  ;;  %v1667_v49 = vld [vmem:[%s2143_s2 + $0x10] sm:$0xff]  }
 0x69c   :  { %v468_v6 = vmul.f32 %v1402_v62, %v460_v0 }
 0x69e   :  { %v476_v8 = vadd.f32 %v1403_v5, %v468_v6  ;;  %v1421_v5 = vld [vmem:[%s2144_s3 + $0x1] ss:$0 sm:$0xff] }
 0x6a0   :  { %v477_v9 = vpack.c.bf16 %v476_v8, %v475_v7 }
 0x6a2   :  { %1565 = vmatmul.mubr.msk.bf16.vlgmr.msra.gmra.mxu0 %vm85_vm1, %v477_v9 }
 0x6a3   :  { %1584 = vmatprep.mubr.msk.bf16.mxu0 %vm1749_vm0, %v1748_v1  ;;  %1581 = vmatpush3.bf16.msra.mxu0 %v1666_v48 }
 0x6a4   :  { %1582 = vmatprep.subr.bf16.mxu0 %v1748_v1 }
 0x6a7   :  { %1583 = vmatpush3.bf16.msra.mxu0 %v1667_v49 }
 0x762   :  { %v538_v14 = vpop.f32.mrf.mxu0 }
 0x763   :  { %v539_v16 = vadd.f32 %v1404_v13, %v538_v14 }
 0x764   :  { %v1566_v15 = vpop.f32.mrf.mxu0 }
 0x765   :  { %v545_v20 = vmax.f32 %v539_v16, 0.0 }
 0x766   :  { %v541_v17 = vpop.f32.mrf.mxu0 }
 0x767   :  { %v542_v18 = vadd.f32 %v1404_v13, %v541_v17 }
 0x768   :  { %v1567_v19 = vpop.f32.mrf.mxu0 }
 0x769   :  { %v546_v22 = vmax.f32 %v542_v18, 0.0 }
 0x76b   :  { %v547_v23 = vpack.c.bf16 %v546_v22, %v545_v20 }
 0x76d   :  { %1577 = vmatmul.mubr.msk.bf16.vlgmr.msra.gmra.mxu1 %vm587_vm3, %v547_v23 }
 0x82d   :  { %v625_v26 = vpop.f32.mrf.mxu1 }
 0x82e   :  { %v626_v27 = vadd.f32 %v1408_v25, %v625_v26 }
 0x82f   :  { %v1578_v29 = vpop.f32.mrf.mxu1 }
 0x830   :  { %v632_v30 = vadd.f32 %v626_v27, %v475_v7 }
 0x831   :  { %v628_v31 = vpop.f32.mrf.mxu1 }
 0x832   :  { %v629_v32 = vadd.f32 %v1408_v25, %v628_v31  ;;  %v636_v34 = vsel %vm85_vm1, %v632_v30, 0.0 }
 0x833   :  { %637 = vadd.xlane.f32.xlu0 %v636_v34  ;;  %v1579_v35 = vpop.f32.mrf.mxu1 }
 0x834   :  { %v633_v36 = vadd.f32 %v629_v32, %v476_v8 }
 0x836   :  { %v639_v37 = vsel %vm85_vm1, %v633_v36, 0.0 }
 0x837   :  { %640 = vadd.xlane.f32.xlu1 %v639_v37 }
 0x8bc   :  { %v638_v38 = vpop.xlane.xlu0 %637 }
 0x8bd   :  { %v642_v39 = vmul.f32 0.03125, %v638_v38 }
 0x8bf   :  { %v644_v40 = vsub.f32 %v632_v30, %v642_v39 }
 0x8c0   :  { %v641_v41 = vpop.xlane.xlu1 %640 }
 0x8c1   :  { %v643_v42 = vmul.f32 0.03125, %v641_v41  ;;  %v646_v43 = vmul.f32 %v644_v40, %v644_v40 }
 0x8c3   :  { %v645_v44 = vsub.f32 %v633_v36, %v643_v42  ;;  %v648_v45 = vsel %vm85_vm1, %v646_v43, 0.0 }
 0x8c4   :  { %649 = vadd.xlane.f32.xlu0 %v648_v45 }
 0x8c5   :  { %v647_v46 = vmul.f32 %v645_v44, %v645_v44 }
 0x8c7   :  { %v651_v47 = vsel %vm85_vm1, %v647_v46, 0.0 }
 0x8c8   :  { %652 = vadd.xlane.f32.xlu1 %v651_v47 }
 0x94d   :  { %v650_v50 = vpop.xlane.xlu0 %649 }
 0x94e   :  { %v654_v3 = vmul.f32 0.03125, %v650_v50 }
 0x950   :  { %v656_v51 = vadd.f32 1e-05, %v654_v3 }
 0x951   :  { %v653_v4 = vpop.xlane.xlu1 %652 }
 0x952   :  { %1698 = vrsqrt.f32 %v656_v51  ;;  %v655_v52 = vmul.f32 0.03125, %v653_v4 }
 0x954   :  { %v657_v53 = vadd.f32 1e-05, %v655_v52 }
 0x956   :  { %1700 = vrsqrt.f32 %v657_v53 }
 0x95f   :  { %v1699_v54 = vpop.eup %1698 }
 0x960   :  { %v660_v55 = vmul.f32 %v1699_v54, %v644_v40 }
 0x962   :  { %v668_v59 = vmul.f32 %v1414_v56, %v660_v55 }
 0x963   :  { %v1701_v57 = vpop.eup %1700 }
 0x964   :  { %v661_v58 = vmul.f32 %v1701_v57, %v645_v44  ;;  %v2008_v62 = vadd.f32 %v1415_v60, %v668_v59 }
 0x966   :  { %v669_v61 = vmul.f32 %v1414_v56, %v661_v58 }
 0x968   :  { %v2010_v63 = vadd.f32 %v1415_v60, %v669_v61 }
 0x96a   :  { %v678_v0 = vpack.c.bf16 %v2010_v63, %v2008_v62 }
 0x96c   :  { %1585 = vmatmul.mubr.msk.bf16.vlgmr.msra.gmra.mxu0 %vm85_vm1, %v678_v0 }
 0xa2c   :  { %v741_v2 = vpop.f32.mrf.mxu0 }
 0xa2d   :  { %v742_v8 = vadd.f32 %v1421_v5, %v741_v2 }
 0xa2e   :  { %v1586_v6 = vpop.f32.mrf.mxu0 }
 0xa30   :  { %v744_v7 = vpop.f32.mrf.mxu0 }
 0xa31   :  { %v745_v9 = vadd.f32 %v1421_v5, %v744_v7 }
 0xa32   :  { %v1587_v10 = vpop.f32.mrf.mxu0 }
 0xa33   :  { %v2018_v11 = vpack.c.bf16 %v745_v9, %v742_v8  ;;  %v1668_v8 = vld [vmem:[%s2145_s4 + $0x18] sm:$0xff]   ;;  %v1669_v9 = vld [vmem:[%s2145_s4 + $0x10] sm:$0xff]  }
 0xa35   :  { %750 = vrot.lane.b32.xlu0 %v2018_v11, %s1751_s18  ;;  %1592 = vmatprep.mubr.msk.bf16.mxu0 %vm138_vm2, %v2018_v11 }
 0xaa7   :  { %v751_v12 = vpop.permute.xlu0 %750 }
 0xaa8   :  { %754 = vrot.lane.b32.xlu1 %v751_v12, %s1750_s17 }
 0xaac   :  { %752 = vrot.lane.b32.xlu1 %v2018_v11, %s1750_s17 }
 0xb1a   :  { %v755_v13 = vpop.permute.xlu1 %754 }
 0xb1b   :  { %v766_v14 = vsel %vm138_vm2, %v755_v13, 0  ;;  %1646 = vmatprep.subr.msk.bf16.mxu0 %vm138_vm2, %v755_v13 }
 0xb1c   :  { %1589 = vmatpush3.bf16.xpose.msra.mxu0 %v766_v14 }
 0xb1e   :  { %v753_v15 = vpop.permute.xlu1 %752 }
 0xb1f   :  { %1647 = vmatprep.subr.msk.bf16.mxu0 %vm138_vm2, %v753_v15  ;;  %v763_v16 = vsel %vm138_vm2, %v753_v15, 0 }
 0xb24   :  { %1591 = vmatpush3.bf16.xpose.msra.mxu0 %v763_v16 }
 0xb25   :  { %1610 = vmatprep.subr.bf16.mxu0 %v1748_v1 }
 0xb2b   :  { %1593 = vmatmul.mubr.msk.bf16.vlgmr.msra.gmra.mxu0 %vm138_vm2, %v751_v12 }
 0xb2c   :  { %1612 = vmatprep.mubr.msk.bf16.mxu0 %vm1749_vm0, %v1748_v1  ;;  %1611 = vmatpush3.bf16.msra.mxu0 %v1669_v9 }
 0xb2d   :  { %1624 = vmatprep.subr.bf16.mxu0 %v1748_v1 }
 0xbeb   :  { %v1594_v17 = vpop.f32.mrf.mxu0 }
 0xbec   :  { %v819_v19 = vmul.f32 0.25, %v1594_v17 }
 0xbed   :  { %v802_v18 = vpop.f32.mrf.mxu0 }
 0xbee   :  { %v817_v20 = vmul.f32 0.25, %v802_v18  ;;  %v823_v30 = vadd.f32 %v819_v19, %v1909_v33  ;;  %v1438_v19 = vld [vmem:[%s2146_s5 + $0x1] ss:$0 sm:$0xff] }
 0xbef   :  { %v1595_v22 = vpop.f32.mrf.mxu0 }
 0xbf0   :  { %v821_v23 = vadd.f32 %v817_v20, %v1891_v21  ;;  %v820_v26 = vmul.f32 0.25, %v1595_v22  ;;  %v831_v32 = vsel %vm85_vm1, %v823_v30, -inf }
 0xbf1   :  { %v805_v25 = vpop.f32.mrf.mxu0 }
 0xbf2   :  { %v818_v27 = vmul.f32 0.25, %v805_v25  ;;  %v825_v29 = vsel %vm85_vm1, %v821_v23, -inf  ;;  %v824_v35 = vadd.f32 %v820_v26, %v1896_v24 }
 0xbf3   :  { %826 = vmax.xlane.f32.xlu0 %v825_v29 }
 0xbf4   :  { %v822_v31 = vadd.f32 %v818_v27, %v1902_v28  ;;  %v834_v21 = vsel %vm85_vm1, %v824_v35, -inf }
 0xbf6   :  { %v828_v34 = vsel %vm85_vm1, %v822_v31, -inf }
 0xbf7   :  { %832 = vmax.xlane.f32.xlu0 %v831_v32  ;;  %829 = vmax.xlane.f32.xlu1 %v828_v34 }
 0xbfb   :  { %835 = vmax.xlane.f32.xlu0 %v834_v21 }
 0xc7c   :  { %v827_v36 = vpop.xlane.xlu0 %826 }
 0xc7d   :  { %v837_v37 = vsub.f32 %v821_v23, %v827_v36 }
 0xc7f   :  { %v841_v33 = vmul.f32 1.442695, %v837_v37 }
 0xc80   :  { %v833_v38 = vpop.xlane.xlu0 %832  ;;  %v830_v39 = vpop.xlane.xlu1 %829 }
 0xc81   :  { %v839_v40 = vsub.f32 %v823_v30, %v833_v38  ;;  %v838_v42 = vsub.f32 %v822_v31, %v830_v39 }
 0xc83   :  { %v845_v41 = vmul.f32 1.442695, %v839_v40  ;;  %v843_v44 = vmul.f32 1.442695, %v838_v42 }
 0xc84   :  { %v836_v28 = vpop.xlane.xlu0 %835 }
 0xc85   :  { %1702 = vpow2.f32 %v845_v41  ;;  %v840_v43 = vsub.f32 %v824_v35, %v836_v28 }
 0xc86   :  { %1704 = vpow2.f32 %v841_v33 }
 0xc87   :  { %v847_v45 = vmul.f32 1.442695, %v840_v43  ;;  %v1671_v43 = vld [vmem:[%s2149_s8 + $0x10] sm:$0xff]  }
 0xc89   :  { %1706 = vpow2.f32 %v847_v45 }
 0xc8a   :  { %1708 = vpow2.f32 %v843_v44  ;;  %v1672_v44 = vld [vmem:[%s2151_s10 + $0x38] sm:$0xff]  }
 0xc92   :  { %v1703_v24 = vpop.eup %1702 }
 0xc93   :  { %v855_v46 = vsel %vm85_vm1, %v1703_v24, 0.0  ;;  %v1705_v47 = vpop.eup %1704 }
 0xc94   :  { %856 = vadd.xlane.f32.xlu1 %v855_v46  ;;  %v849_v50 = vsel %vm85_vm1, %v1705_v47, 0.0 }
 0xc96   :  { %v1707_v48 = vpop.eup %1706 }
 0xc97   :  { %v858_v49 = vsel %vm85_vm1, %v1707_v48, 0.0  ;;  %v1709_v3 = vpop.eup %1708 }
 0xc98   :  { %859 = vadd.xlane.f32.xlu0 %v858_v49  ;;  %850 = vadd.xlane.f32.xlu1 %v849_v50  ;;  %v852_v51 = vsel %vm85_vm1, %v1709_v3, 0.0 }
 0xc9c   :  { %853 = vadd.xlane.f32.xlu0 %v852_v51  ;;  %v1441_v51 = vld [vmem:[%s2147_s6 + $0x1] ss:$0 sm:$0xff] }
 0xca9   :  { %873 = vrot.lane.b32.xlu1 %v751_v12, %s1752_s1 }
 0xcb2   :  { %871 = vrot.lane.b32.xlu0 %v2018_v11, %s1752_s1 }
 0xd1d   :  { %v857_v4 = vpop.xlane.xlu1 %856 }
 0xd21   :  { %v860_v52 = vpop.xlane.xlu0 %859  ;;  %v851_v53 = vpop.xlane.xlu1 %850 }
 0xd22   :  { %1710 = vrcp.f32 %v860_v52 }
 0xd23   :  { %1712 = vrcp.f32 %v851_v53 }
 0xd24   :  { %1714 = vrcp.f32 %v857_v4 }
 0xd25   :  { %v854_v54 = vpop.xlane.xlu0 %853  ;;  %v874_v55 = vpop.permute.xlu1 %873 }
 0xd26   :  { %1716 = vrcp.f32 %v854_v54  ;;  %1596 = vmatprep.subr.bf16.mxu1 %v874_v55  ;;  %v1442_v54 = vld [vmem:[%s2148_s7 + $0x1] ss:$0 sm:$0xff] }
 0xd27   :  { %1597 = vmatpush3.bf16.msra.mxu1 %v874_v55 }
 0xd29   :  { %v872_v56 = vpop.permute.xlu0 %871 }
 0xd2a   :  { %1598 = vmatprep.subr.bf16.mxu1 %v872_v56 }
 0xd2b   :  { %1599 = vmatpush3.bf16.msra.mxu1 %v872_v56 }
 0xd2c   :  { %1604 = vmatprep.subr.bf16.mxu1 %v1748_v1 }
 0xd2f   :  { %v1711_v57 = vpop.eup %1710 }
 0xd30   :  { %v1713_v58 = vpop.eup %1712  ;;  %v868_v61 = vmul.f32 %v1711_v57, %v1707_v48 }
 0xd31   :  { %v1715_v59 = vpop.eup %1714  ;;  %v865_v0 = vmul.f32 %v1713_v58, %v1705_v47 }
 0xd32   :  { %v867_v5 = vmul.f32 %v1715_v59, %v1703_v24  ;;  %v1673_v59 = vld [vmem:[%s2151_s10 + $0x30] sm:$0xff]  }
 0xd33   :  { %v1717_v60 = vpop.eup %1716 }
 0xd34   :  { %v866_v2 = vmul.f32 %v1717_v60, %v1709_v3  ;;  %v870_v7 = vpack.c.bf16 %v868_v61, %v867_v5  ;;  %v1674_v60 = vld [vmem:[%s2151_s10 + $0x28] sm:$0xff]   ;;  %v1675_v61 = vld [vmem:[%s2151_s10 + $0x20] sm:$0xff]  }
 0xd36   :  { %v869_v6 = vpack.c.bf16 %v866_v2, %v865_v0  ;;  %v1448_v0 = vld [vmem:[%s2150_s9 + $0x1] ss:$0 sm:$0xff] }
 0xd38   :  { %1600 = vmatprep.mubr.msk.bf16.mxu1 %vm85_vm1, %v869_v6 }
 0xd39   :  { %1601 = vmatmul.mubr.msk.bf16.vlgmr.msra.gmra.mxu1 %vm85_vm1, %v870_v7 }
 0xd3a   :  { %1606 = vmatprep.mubr.msk.bf16.mxu1 %vm1749_vm0, %v1748_v1  ;;  %1605 = vmatpush3.bf16.msra.mxu1 %v1668_v8 }
 0xd3b   :  { %1616 = vmatprep.subr.bf16.mxu1 %v1748_v1 }
 0xdf9   :  { %v1602_v10 = vpop.f32.mrf.mxu1 }
 0xdfb   :  { %v917_v11 = vpop.f32.mrf.mxu1 }
 0xdfd   :  { %v1603_v12 = vpop.f32.mrf.mxu1 }
 0xdfe   :  { %v938_v13 = vpack.c.bf16 %v1603_v12, %v1602_v10 }
 0xdff   :  { %v920_v14 = vpop.f32.mrf.mxu1 }
 0xe00   :  { %v937_v15 = vpack.c.bf16 %v920_v14, %v917_v11  ;;  %1607 = vmatmul.mubr.msk.bf16.vlgmr.msra.gmra.mxu1 %vm138_vm2, %v938_v13  ;;  %v1461_v13 = vld [vmem:[%s2152_s11 + $0x1] ss:$0 sm:$0xff] }
 0xe01   :  { %1620 = vmatprep.mubr.msk.bf16.mxu1 %vm1749_vm0, %v1748_v1 }
 0xe02   :  { %1613 = vmatmul.mubr.msk.bf16.vlgmr.msra.gmra.mxu0 %vm138_vm2, %v937_v15 }
 0xe03   :  { %1632 = vmatprep.mubr.msk.bf16.mxu0 %vm1749_vm0, %v1748_v1  ;;  %1625 = vmatpush3.bf16.msra.mxu0 %v1672_v44 }
 0xe04   :  { %1626 = vmatprep.subr.bf16.mxu0 %v1748_v1 }
 0xe07   :  { %1627 = vmatpush3.bf16.msra.mxu0 %v1673_v59 }
 0xe08   :  { %1628 = vmatprep.subr.bf16.mxu0 %v1748_v1 }
 0xe0b   :  { %1629 = vmatpush3.bf16.msra.mxu0 %v1674_v60 }
 0xe0c   :  { %1630 = vmatprep.subr.bf16.mxu0 %v1748_v1 }
 0xe0f   :  { %1631 = vmatpush3.bf16.msra.mxu0 %v1675_v61 }
 0xec0   :  { %v982_v16 = vpop.f32.mrf.mxu1 }
 0xec2   :  { %v1608_v17 = vpop.f32.mrf.mxu1  ;;  %v1032_v18 = vpop.f32.mrf.mxu0 }
 0xec3   :  { %v1033_v20 = vadd.f32 %v1032_v18, %v982_v16 }
 0xec4   :  { %v985_v22 = vpop.f32.mrf.mxu1  ;;  %v1614_v23 = vpop.f32.mrf.mxu0 }
 0xec5   :  { %v1047_v25 = vadd.f32 %v1438_v19, %v1033_v20 }
 0xec6   :  { %v1609_v26 = vpop.f32.mrf.mxu1  ;;  %v1035_v27 = vpop.f32.mrf.mxu0 }
 0xec7   :  { %v1036_v29 = vadd.f32 %v1035_v27, %v985_v22  ;;  %v1049_v30 = vadd.f32 %v1047_v25, %v2008_v62 }
 0xec8   :  { %v1615_v31 = vpop.f32.mrf.mxu0 }
 0xec9   :  { %v1048_v32 = vadd.f32 %v1438_v19, %v1036_v29  ;;  %v1055_v34 = vsel %vm85_vm1, %v1049_v30, 0.0 }
 0xeca   :  { %1056 = vadd.xlane.f32.xlu1 %v1055_v34 }
 0xecb   :  { %v1050_v35 = vadd.f32 %v1048_v32, %v2010_v63  ;;  %v1670_v63 = vld [vmem:[%s2149_s8 + $0x18] sm:$0xff]  }
 0xecc   :  { %1617 = vmatpush3.bf16.msra.mxu1 %v1670_v63 }
 0xecd   :  { %v1058_v21 = vsel %vm85_vm1, %v1050_v35, 0.0  ;;  %1618 = vmatprep.subr.bf16.mxu1 %v1748_v1 }
 0xece   :  { %1059 = vadd.xlane.f32.xlu0 %v1058_v21 }
 0xed0   :  { %1619 = vmatpush3.bf16.msra.mxu1 %v1671_v43  ;;  %v1469_v43 = vld [vmem:[%s2153_s12 + $0x1] ss:$0 sm:$0xff]  ;;  %s1753_s12 = smov [#allocation2]  }
 0xed1   :  { %1636 = vmatprep.subr.bf16.mxu1 %v1748_v1  ;;  %s1378_s26 = sshll.u32 %s1753_s12, 4  ;;  %s1379_s26 = int_to_ptr.vmem [resolvable:$true] %s1378_s26 }
 0xed2   :  { %p1731_p1 = scmp.lt.s32.totalorder %s1379_s26, %s1379_s26 }
 0xf53   :  { %v1057_v36 = vpop.xlane.xlu1 %1056 }
 0xf54   :  { %v1061_v37 = vmul.f32 0.03125, %v1057_v36 }
 0xf56   :  { %v1063_v38 = vsub.f32 %v1049_v30, %v1061_v37  ;;  %v1676_v37 = vld [vmem:[%s2155_s14 + $0x8] sm:$0xff]  }
 0xf57   :  { %v1060_v39 = vpop.xlane.xlu0 %1059 }
 0xf58   :  { %v1062_v40 = vmul.f32 0.03125, %v1060_v39  ;;  %v1065_v33 = vmul.f32 %v1063_v38, %v1063_v38 }
 0xf5a   :  { %v1064_v41 = vsub.f32 %v1050_v35, %v1062_v40  ;;  %v1067_v42 = vsel %vm85_vm1, %v1065_v33, 0.0 }
 0xf5b   :  { %1068 = vadd.xlane.f32.xlu1 %v1067_v42 }
 0xf5c   :  { %v1066_v62 = vmul.f32 %v1064_v41, %v1064_v41 }
 0xf5e   :  { %v1070_v28 = vsel %vm85_vm1, %v1066_v62, 0.0 }
 0xf5f   :  { %1071 = vadd.xlane.f32.xlu0 %v1070_v28 }
 0xfe4   :  { %v1069_v45 = vpop.xlane.xlu1 %1068 }
 0xfe5   :  { %v1073_v24 = vmul.f32 0.03125, %v1069_v45 }
 0xfe7   :  { %v1075_v46 = vadd.f32 1e-05, %v1073_v24 }
 0xfe8   :  { %v1072_v47 = vpop.xlane.xlu0 %1071 }
 0xfe9   :  { %1718 = vrsqrt.f32 %v1075_v46  ;;  %v1074_v48 = vmul.f32 0.03125, %v1072_v47 }
 0xfeb   :  { %v1076_v49 = vadd.f32 1e-05, %v1074_v48 }
 0xfed   :  { %1720 = vrsqrt.f32 %v1076_v49 }
 0xff6   :  { %v1719_v50 = vpop.eup %1718 }
 0xff7   :  { %v1079_v3 = vmul.f32 %v1719_v50, %v1063_v38  ;;  %v1677_v38 = vld [vmem:[%s2155_s14] sm:$0xff]  }
 0xff8   :  { %v1471_v50 = vld [vmem:[%s2156_s15] ss:$0 sm:$0xff] }
 0xff9   :  { %v1087_v53 = vmul.f32 %v1441_v51, %v1079_v3 }
 0xffa   :  { %v1721_v4 = vpop.eup %1720 }
 0xffb   :  { %v1080_v52 = vmul.f32 %v1721_v4, %v1064_v41  ;;  %v1095_v56 = vadd.f32 %v1442_v54, %v1087_v53 }
 0xffd   :  { %v1088_v55 = vmul.f32 %v1441_v51, %v1080_v52 }
 0xfff   :  { %v1096_v57 = vadd.f32 %v1442_v54, %v1088_v55 }
0x1001   :  { %v1097_v58 = vpack.c.bf16 %v1096_v57, %v1095_v56 }
0x1003   :  { %1621 = vmatmul.mubr.msk.bf16.vlgmr.msra.gmra.mxu1 %vm85_vm1, %v1097_v58 }
0x1004   :  { %1640 = vmatprep.mubr.msk.bf16.mxu1 %vm1749_vm0, %v1748_v1  ;;  %1637 = vmatpush3.bf16.msra.mxu1 %v1676_v37 }
0x1005   :  { %1638 = vmatprep.subr.bf16.mxu1 %v1748_v1  ;;  %v1470_v1 = vld [vmem:[%s2154_s13 + $0x1] ss:$0 sm:$0xff]  ;;  %s1726_s13 = scalar_lea.vmem %s1379_s26, 256 }
0x1006   :  { %p1727_p0 = scmp.ne.s32.totalorder %s1379_s26, %s1726_s13  ;;  %p1732_p2 = scmp.lt.s32.totalorder %s1726_s13, %s1726_s13 }
0x1008   :  { %1639 = vmatpush3.bf16.msra.mxu1 %v1677_v38  ;;  %p1733_p3 = por %p1732_p2, %p1731_p1 }
0x100a   :  { %p1734_p4 = pnand %p1733_p3, %p1727_p0 }
0x10c3   :  { %v1160_v2 = vpop.f32.mrf.mxu1 }
0x10c4   :  { %v1161_v6 = vadd.f32 %v1448_v0, %v1160_v2 }
0x10c5   :  { %v1622_v5 = vpop.f32.mrf.mxu1 }
0x10c6   :  { %v1167_v10 = vmax.f32 %v1161_v6, 0.0 }
0x10c7   :  { %v1163_v7 = vpop.f32.mrf.mxu1 }
0x10c8   :  { %v1164_v8 = vadd.f32 %v1448_v0, %v1163_v7 }
0x10c9   :  { %v1623_v9 = vpop.f32.mrf.mxu1 }
0x10ca   :  { %v1168_v11 = vmax.f32 %v1164_v8, 0.0 }
0x10cc   :  { %v1169_v12 = vpack.c.bf16 %v1168_v11, %v1167_v10 }
0x10ce   :  { %1633 = vmatmul.mubr.msk.bf16.vlgmr.msra.gmra.mxu0 %vm587_vm3, %v1169_v12 }
0x118e   :  { %v1248_v14 = vpop.f32.mrf.mxu0 }
0x118f   :  { %v1249_v15 = vadd.f32 %v1461_v13, %v1248_v14 }
0x1190   :  { %v1634_v16 = vpop.f32.mrf.mxu0 }
0x1191   :  { %v1255_v17 = vadd.f32 %v1249_v15, %v1095_v56 }
0x1192   :  { %v1251_v18 = vpop.f32.mrf.mxu0 }
0x1193   :  { %v1252_v19 = vadd.f32 %v1461_v13, %v1251_v18  ;;  %v1261_v20 = vsel %vm85_vm1, %v1255_v17, 0.0 }
0x1194   :  { %1262 = vadd.xlane.f32.xlu1 %v1261_v20  ;;  %v1635_v22 = vpop.f32.mrf.mxu0 }
0x1195   :  { %v1256_v23 = vadd.f32 %v1252_v19, %v1096_v57 }
0x1197   :  { %v1264_v25 = vsel %vm85_vm1, %v1256_v23, 0.0 }
0x1198   :  { %1265 = vadd.xlane.f32.xlu0 %v1264_v25 }
0x121d   :  { %v1263_v26 = vpop.xlane.xlu1 %1262 }
0x121e   :  { %v1267_v27 = vmul.f32 0.03125, %v1263_v26 }
0x1220   :  { %v1269_v29 = vsub.f32 %v1255_v17, %v1267_v27 }
0x1221   :  { %v1266_v30 = vpop.xlane.xlu0 %1265 }
0x1222   :  { %v1268_v31 = vmul.f32 0.03125, %v1266_v30  ;;  %v1271_v32 = vmul.f32 %v1269_v29, %v1269_v29 }
0x1224   :  { %v1270_v34 = vsub.f32 %v1256_v23, %v1268_v31  ;;  %v1273_v35 = vsel %vm85_vm1, %v1271_v32, 0.0 }
0x1225   :  { %1274 = vadd.xlane.f32.xlu1 %v1273_v35 }
0x1226   :  { %v1272_v21 = vmul.f32 %v1270_v34, %v1270_v34 }
0x1228   :  { %v1276_v36 = vsel %vm85_vm1, %v1272_v21, 0.0 }
0x1229   :  { %1277 = vadd.xlane.f32.xlu0 %v1276_v36 }
0x12ae   :  { %v1275_v39 = vpop.xlane.xlu1 %1274 }
0x12af   :  { %v1279_v40 = vmul.f32 0.03125, %v1275_v39 }
0x12b1   :  { %v1281_v33 = vadd.f32 1e-05, %v1279_v40 }
0x12b2   :  { %v1278_v41 = vpop.xlane.xlu0 %1277 }
0x12b3   :  { %1722 = vrsqrt.f32 %v1281_v33  ;;  %v1280_v42 = vmul.f32 0.03125, %v1278_v41 }
0x12b5   :  { %v1282_v62 = vadd.f32 1e-05, %v1280_v42 }
0x12b7   :  { %1724 = vrsqrt.f32 %v1282_v62 }
0x12c0   :  { %v1723_v28 = vpop.eup %1722 }
0x12c1   :  { %v1285_v63 = vmul.f32 %v1723_v28, %v1269_v29 }
0x12c3   :  { %v1293_v24 = vmul.f32 %v1469_v43, %v1285_v63 }
0x12c4   :  { %v1725_v44 = vpop.eup %1724 }
0x12c5   :  { %v1286_v45 = vmul.f32 %v1725_v44, %v1270_v34  ;;  %v1301_v47 = vadd.f32 %v1470_v1, %v1293_v24 }
0x12c7   :  { %v1294_v46 = vmul.f32 %v1469_v43, %v1286_v45 }
0x12c9   :  { %v1302_v48 = vadd.f32 %v1470_v1, %v1294_v46 }
0x12cb   :  { %v1303_v49 = vpack.c.bf16 %v1302_v48, %v1301_v47 }
0x12cd   :  { %1641 = vmatmul.mubr.msk.bf16.vlgmr.msra.gmra.mxu1 %vm85_vm1, %v1303_v49 }
0x138d   :  { %v1364_v3 = vpop.f32.mrf.mxu1 }
0x138e   :  { %v1365_v51 = vadd.f32 %v1471_v50, %v1364_v3 }
0x138f   :  { %v1642_v4 = vpop.f32.mrf.mxu1 }
0x1390   :  { %1371 = vst [vmem:[#allocation2] sm:$0xff] %v1365_v51 }
0x1391   :  { %v1367_v52 = vpop.f32.mrf.mxu1 }
0x1392   :  { %v1368_v53 = vadd.f32 %v1471_v50, %v1367_v52 }
0x1393   :  { %v1643_v54 = vpop.f32.mrf.mxu1 }
0x1394   :  { %1372 = vst [vmem:[#allocation2 + $0x8] sm:$0xff] %v1368_v53 }
0x1395   :  { %1737 = shalt.err (!%p1734_p4)
}
0x1396   :  { %s1754_s27 = smov 128   ;;  %s1755_s15 = smov 8  }
0x1397   :  { %1384 = dma.vmem_to_hbm [thread:$0]  %s1379_s26, 256, %s2157_s16, [#allocation3], %s1754_s27, %s1754_s27, %s1755_s15  }
0x1398   :  { %1746 = dma.done.wait [#allocation3], 256  }
0x1399   :  { %1747 = vsyncadd [#allocation3], 4294967040 }
0x139a   :  { %1388 = vsyncpa [#allocation3], 1 }

</bundles_post_ra>
